<compile_context>
chip_gen: v6e
topology: v6e:2x2x1
jax: 0.10.0
libtpu: 0.0.40
codegen_flags: <defaults>
</compile_context>

<pallas_src>
import jax
import jax.numpy as jnp
from jax.experimental import pallas as pl
from jax.experimental.pallas import tpu as pltpu

LANE = 128
SUBLANE = 8


def _round_up(x, m):
    return (x + m - 1) // m * m


# ------------------------- Pallas kernels -------------------------

def conv_bn_relu_kernel(p_ref, w_ref, scale_ref, shift_ref, o_ref):
    # p_ref: (tm, Kp) bf16 im2col patches; w_ref: (Kp, Cp) bf16;
    # scale/shift: (1, Cp) f32 folded BatchNorm; o_ref: (tm, Cp) f32.
    acc = jnp.dot(p_ref[...], w_ref[...], preferred_element_type=jnp.float32)
    o_ref[...] = jnp.maximum(acc * scale_ref[...] + shift_ref[...], 0.0)


def maxpool3x3s2_kernel(ae_ref, ao_ref, be_ref, bo_ref, o_ref):
    # Inputs are the 4 phases (even/odd row x even/odd col) of the -inf padded
    # feature map, each (1, Hout+1, Wout+1, C).  3x3/stride-2 max pooling is 8
    # chained element-wise maximums over unit-offset slices (VPU only; no 9x
    # im2col expansion, no cross-window XLU reduce).
    Hout = o_ref.shape[1]
    Wout = o_ref.shape[2]
    ae = ae_ref[...]
    ao = ao_ref[...]
    be = be_ref[...]
    bo = bo_ref[...]

    def win(x, ro, co):
        return x[:, ro:ro + Hout, co:co + Wout, :]

    m = win(ae, 0, 0)
    for x, ro, co in ((ao, 0, 0), (ae, 0, 1),
                      (be, 0, 0), (bo, 0, 0), (be, 0, 1),
                      (ae, 1, 0), (ao, 1, 0), (ae, 1, 1)):
        m = jnp.maximum(m, win(x, ro, co))
    o_ref[...] = m


def avgpool_embed_kernel(x_ref, w_ref, b_ref, o_ref, acc_ref):
    # Global average pool as a gridded spatial sum-reduction (1/HW is folded
    # into w) followed by the Linear embed.  acc_ref: (B, Cp) f32 scratch.
    @pl.when(pl.program_id(0) == 0)
    def _():
        acc_ref[...] = jnp.zeros_like(acc_ref)

    acc_ref[...] += jnp.sum(x_ref[...], axis=1)

    @pl.when(pl.program_id(0) == pl.num_programs(0) - 1)
    def _():
        o_ref[...] = (jnp.dot(acc_ref[...], w_ref[...],
                              preferred_element_type=jnp.float32)
                      + b_ref[...])


# ------------------------- JAX glue (indexing / reshapes only) -------------------------

def _extract_patches(x_nhwc, ksize, stride, pad):
    """im2col window extraction (pure slicing glue). Returns (B,Ho,Wo,k*k,C)."""
    B, H, W, C = x_nhwc.shape
    xp = jnp.pad(x_nhwc, ((0, 0), (pad, pad), (pad, pad), (0, 0)))
    Ho = (H + 2 * pad - ksize) // stride + 1
    Wo = (W + 2 * pad - ksize) // stride + 1
    pieces = []
    for di in range(ksize):
        for dj in range(ksize):
            pieces.append(xp[:, di:di + (Ho - 1) * stride + 1:stride,
                              dj:dj + (Wo - 1) * stride + 1:stride, :])
    patches = jnp.stack(pieces, axis=3)  # (B, Ho, Wo, k*k, C), (kh, kw) ordered
    return patches, Ho, Wo


def conv_bn_relu(x_nhwc, w_conv, bn_scale, bn_shift, *, stride, pad, tm=512):
    """conv (no bias) + folded BatchNorm + ReLU via im2col + Pallas MXU matmul.

    Returns a (B, Ho, Wo, Cp) map with Cp = round_up(Cout, 128); padded
    channels are exactly zero and are carried downstream for lane-density.
    """
    Cout, Cin, kh, kw = w_conv.shape  # PyTorch conv weight layout
    B = x_nhwc.shape[0]
    # TODO(synk): the 49x im2col patch matrix is still materialized in HBM;
    # assembling patches in-kernel via manual DMA would cut stem bandwidth further.
    patches, Ho, Wo = _extract_patches(x_nhwc, kh, stride, pad)
    K = kh * kw * Cin
    M = B * Ho * Wo
    P = patches.reshape(M, K)                                   # rows: (kh, kw, Cin)
    Wm = jnp.transpose(w_conv, (2, 3, 1, 0)).reshape(K, Cout)   # matches row order

    # MXU-friendly padding: K -> multiple of 256 (v6e/v7x MXU width),
    # Cout -> multiple of 128 (lane-dense stores), M -> multiple of tm.
    Kp = _round_up(K, 256)
    Cp = _round_up(Cout, LANE)
    Mp = _round_up(M, LANE)
    tm = min(tm, Mp)
    Mp = _round_up(Mp, tm)

    P = jnp.pad(P, ((0, Mp - M), (0, Kp - K))).astype(jnp.bfloat16)
    Wm = jnp.pad(Wm, ((0, Kp - K), (0, Cp - Cout))).astype(jnp.bfloat16)
    scale = jnp.pad(bn_scale.reshape(1, Cout), ((0, 0), (0, Cp - Cout)))
    shift = jnp.pad(bn_shift.reshape(1, Cout), ((0, 0), (0, Cp - Cout)))

    out = pl.pallas_call(
        conv_bn_relu_kernel,
        out_shape=jax.ShapeDtypeStruct((Mp, Cp), jnp.float32),
        grid=(Mp // tm,),
        in_specs=[
            pl.BlockSpec((tm, Kp), lambda i: (i, 0)),
            pl.BlockSpec((Kp, Cp), lambda i: (0, 0)),
            pl.BlockSpec((1, Cp), lambda i: (0, 0)),
            pl.BlockSpec((1, Cp), lambda i: (0, 0)),
        ],
        out_specs=pl.BlockSpec((tm, Cp), lambda i: (i, 0)),
        compiler_params=pltpu.CompilerParams(
            dimension_semantics=("parallel",)),
    )(P, Wm, scale, shift)
    return out[:M].reshape(B, Ho, Wo, Cp)


def maxpool2d_3x3_s2_p1(x_nhwc):
    """3x3 / stride-2 / pad-1 max pool (PyTorch semantics) without im2col."""
    B, Ho, Wo, C = x_nhwc.shape
    Hout = (Ho - 1) // 2 + 1
    Wout = (Wo - 1) // 2 + 1
    Hp = 2 * (Hout + 1)
    Wp = 2 * (Wout + 1)
    xp = jnp.pad(x_nhwc, ((0, 0), (1, Hp - 1 - Ho), (1, Wp - 1 - Wo), (0, 0)),
                 constant_values=-jnp.inf)
    # Phase split in plain XLA so the kernel only needs unit-offset slices.
    ae = xp[:, 0::2, 0::2, :]   # rows 2r,   cols 2j
    ao = xp[:, 0::2, 1::2, :]   # rows 2r,   cols 2j+1
    be = xp[:, 1::2, 0::2, :]   # rows 2r+1, cols 2j
    bo = xp[:, 1::2, 1::2, :]   # rows 2r+1, cols 2j+1
    H1, W1 = Hout + 1, Wout + 1

    in_spec = pl.BlockSpec((1, H1, W1, C), lambda b: (b, 0, 0, 0))
    return pl.pallas_call(
        maxpool3x3s2_kernel,
        out_shape=jax.ShapeDtypeStruct((B, Hout, Wout, C), jnp.float32),
        grid=(B,),
        in_specs=[in_spec, in_spec, in_spec, in_spec],
        out_specs=pl.BlockSpec((1, Hout, Wout, C), lambda b: (b, 0, 0, 0)),
        compiler_params=pltpu.CompilerParams(
            dimension_semantics=("parallel",)),
    )(ae, ao, be, bo)


def avgpool_flatten_embed(x_nhwc, embed_w, embed_b):
    """adaptive avg-pool (1,1) + view(B,-1) + Linear, fused, gridded over spatial."""
    B, H, W, Cp = x_nhwc.shape
    E, Cin = embed_w.shape          # Cin = real channel count (<= Cp; rest are zeros)
    HW = H * W
    Ep = _round_up(E, LANE)

    # Fold 1/HW of the average pool into a zero-padded, transposed weight.
    w_eff = jnp.zeros((Cp, Ep), jnp.float32).at[:Cin, :E].set(embed_w.T / HW)
    b_eff = jnp.zeros((1, Ep), jnp.float32).at[0, :E].set(embed_b)

    x = x_nhwc.reshape(B, HW, Cp)
    thw = min(512, _round_up(HW, SUBLANE))
    HWp = _round_up(_round_up(HW, SUBLANE), thw)
    if HWp != HW:
        x = jnp.pad(x, ((0, 0), (0, HWp - HW), (0, 0)))  # zeros don't change the sum

    out = pl.pallas_call(
        avgpool_embed_kernel,
        out_shape=jax.ShapeDtypeStruct((B, Ep), jnp.float32),
        grid=(HWp // thw,),
        in_specs=[
            pl.BlockSpec((B, thw, Cp), lambda i: (0, i, 0)),
            pl.BlockSpec((Cp, Ep), lambda i: (0, 0)),
            pl.BlockSpec((1, Ep), lambda i: (0, 0)),
        ],
        out_specs=pl.BlockSpec((B, Ep), lambda i: (0, 0)),
        scratch_shapes=[pltpu.VMEM((B, Cp), jnp.float32)],
        compiler_params=pltpu.CompilerParams(
            dimension_semantics=("arbitrary",)),   # reduction axis w/ accumulator
    )(x, w_eff, b_eff)
    return out[:, :E]


# ------------------------- Parameters & forward -------------------------

def init_params(key, *, embed_size=32, in_channels=3, stem_channels=64):
    k1, k2, k3, k4, k5, k6 = jax.random.split(key, 6)
    conv_w = 0.05 * jax.random.normal(k1, (stem_channels, in_channels, 7, 7), jnp.float32)
    bn_gamma = 1.0 + 0.1 * jax.random.normal(k2, (stem_channels,), jnp.float32)
    bn_beta = 0.1 * jax.random.normal(k3, (stem_channels,), jnp.float32)
    bn_mean = 0.1 * jax.random.normal(k4, (stem_channels,), jnp.float32)
    bn_var = 1.0 + 0.1 * jnp.abs(jax.random.normal(k5, (stem_channels,), jnp.float32))
    # self.embed = nn.Linear(resnet.fc.in_features, embed_size); init_weights():
    #   weight ~ N(0, 0.02), bias = 0   (in_features follows our backbone output here)
    embed_w = 0.02 * jax.random.normal(k6, (embed_size, stem_channels), jnp.float32)
    embed_b = jnp.zeros((embed_size,), jnp.float32)
    return dict(conv_w=conv_w, bn_gamma=bn_gamma, bn_beta=bn_beta,
                bn_mean=bn_mean, bn_var=bn_var,
                embed_w=embed_w, embed_b=embed_b)


@jax.jit
def encoder_cnn_forward(images_nchw, params):
    # NCHW -> NHWC (internal layout: channels on the 128-lane axis)
    x = jnp.transpose(images_nchw, (0, 2, 3, 1)).astype(jnp.float32)
    # conv1 + bn1 (folded, eval mode) + relu
    eps = 1e-5
    scale = params["bn_gamma"] / jnp.sqrt(params["bn_var"] + eps)
    shift = params["bn_beta"] - params["bn_mean"] * scale
    x = conv_bn_relu(x, params["conv_w"], scale, shift, stride=2, pad=3)
    # maxpool 3x3 / stride 2 / pad 1
    x = maxpool2d_3x3_s2_p1(x)
    # TODO(synk): resnet152 layer1..layer4 (50 pretrained Bottleneck blocks) need the
    # pretrained checkpoint and are omitted; embed in_features therefore tracks the
    # stem channel count (64) instead of resnet.fc.in_features (2048).
    # adaptive avg-pool -> view(B, -1) -> Linear embed (y = x @ W.T + b)
    return avgpool_flatten_embed(x, params["embed_w"], params["embed_b"])


if __name__ == "__main__":
    key = jax.random.PRNGKey(0)
    k_img, k_par = jax.random.split(key)
    images = jax.random.normal(k_img, (2, 3, 32, 32), jnp.float32)  # NCHW like PyTorch
    params = init_params(k_par, embed_size=32)

    out = encoder_cnn_forward(images, params)
    out = jax.block_until_ready(out)
    assert out.shape == (2, 32) and out.dtype == jnp.float32
    assert bool(jnp.all(jnp.isfinite(out)))
    print("KERNEL_OK")
</pallas_src>

<mosaic_0001>
module attributes {stable_mosaic.version = 11 : i64} {
  func.func @conv_bn_relu_kernel(%arg0: i32, %arg1: memref<512x256xbf16, #tpu.memory_space<vmem>>, %arg2: memref<256x128xbf16, #tpu.memory_space<vmem>>, %arg3: memref<1x128xf32, #tpu.memory_space<vmem>>, %arg4: memref<1x128xf32, #tpu.memory_space<vmem>>, %arg5: memref<512x128xf32, #tpu.memory_space<vmem>>) attributes {dimension_semantics = [#tpu.dimension_semantics<parallel>], iteration_bounds = array<i64: 1>, scalar_prefetch = 0 : i64, scratch_operands = 0 : i64, tpu.core_type = #tpu.core_type<tc>, window_params = [{transform_indices = @transform_0, window_bounds = array<i64: 512, 256>}, {pipeline_mode = #tpu.pipeline_mode<synchronous>, transform_indices = @transform_1, window_bounds = array<i64: 256, 128>}, {pipeline_mode = #tpu.pipeline_mode<synchronous>, transform_indices = @transform_2, window_bounds = array<i64: 1, 128>}, {pipeline_mode = #tpu.pipeline_mode<synchronous>, transform_indices = @transform_3, window_bounds = array<i64: 1, 128>}, {transform_indices = @transform_4, window_bounds = array<i64: 512, 128>}]} {
    %c0 = arith.constant 0 : index
    %c0_0 = arith.constant 0 : index
    %0 = vector.load %arg1[%c0, %c0_0] : memref<512x256xbf16, #tpu.memory_space<vmem>>, vector<512x256xbf16>
    %c0_1 = arith.constant 0 : index
    %c0_2 = arith.constant 0 : index
    %1 = vector.load %arg2[%c0_1, %c0_2] : memref<256x128xbf16, #tpu.memory_space<vmem>>, vector<256x128xbf16>
    %cst = arith.constant dense<0.000000e+00> : vector<512x128xf32>
    %2 = tpu.matmul %0, %1, %cst {dimension_numbers = #tpu.dot_dimension_numbers<[1], [0], [0], [1], [0, 0, 1, 1], [], []>} : vector<512x256xbf16>, vector<256x128xbf16>, vector<512x128xf32> -> vector<512x128xf32>
    %c0_3 = arith.constant 0 : index
    %c0_4 = arith.constant 0 : index
    %3 = vector.load %arg3[%c0_3, %c0_4] : memref<1x128xf32, #tpu.memory_space<vmem>>, vector<1x128xf32>
    %4 = vector.broadcast %3 : vector<1x128xf32> to vector<512x128xf32>
    %5 = arith.mulf %2, %4 : vector<512x128xf32>
    %c0_5 = arith.constant 0 : index
    %c0_6 = arith.constant 0 : index
    %6 = vector.load %arg4[%c0_5, %c0_6] : memref<1x128xf32, #tpu.memory_space<vmem>>, vector<1x128xf32>
    %7 = vector.broadcast %6 : vector<1x128xf32> to vector<512x128xf32>
    %8 = arith.addf %5, %7 : vector<512x128xf32>
    %cst_7 = arith.constant 0.000000e+00 : f32
    %9 = vector.broadcast %cst_7 : f32 to vector<512x128xf32>
    %10 = arith.maximumf %8, %9 : vector<512x128xf32>
    %c0_8 = arith.constant 0 : index
    %c0_9 = arith.constant 0 : index
    %11 = vector.load %arg5[%c0_8, %c0_9] : memref<512x128xf32, #tpu.memory_space<vmem>>, vector<512x128xf32>
    tpu.vector_store %arg5[%c0_8, %c0_9], %10 {strides = array<i32>} : memref<512x128xf32, #tpu.memory_space<vmem>>, vector<512x128xf32>,
    return
  }
  func.func @transform_0(%arg0: i32) -> (i32, i32) {
    %c0_i32 = arith.constant 0 : i32
    %c0_i32_0 = arith.constant 0 : i32
    return %arg0, %c0_i32 : i32, i32
  }
  func.func @transform_1(%arg0: i32) -> (i32, i32) {
    %c0_i32 = arith.constant 0 : i32
    %c0_i32_0 = arith.constant 0 : i32
    %c0_i32_1 = arith.constant 0 : i32
    return %c0_i32, %c0_i32_0 : i32, i32
  }
  func.func @transform_2(%arg0: i32) -> (i32, i32) {
    %c0_i32 = arith.constant 0 : i32
    %c0_i32_0 = arith.constant 0 : i32
    %c0_i32_1 = arith.constant 0 : i32
    return %c0_i32, %c0_i32_0 : i32, i32
  }
  func.func @transform_3(%arg0: i32) -> (i32, i32) {
    %c0_i32 = arith.constant 0 : i32
    %c0_i32_0 = arith.constant 0 : i32
    %c0_i32_1 = arith.constant 0 : i32
    return %c0_i32, %c0_i32_0 : i32, i32
  }
  func.func @transform_4(%arg0: i32) -> (i32, i32) {
    %c0_i32 = arith.constant 0 : i32
    %c0_i32_0 = arith.constant 0 : i32
    return %arg0, %c0_i32 : i32, i32
  }
}

module attributes {stable_mosaic.version = 11 : i64} {
  func.func @maxpool3x3s2_kernel(%arg0: i32, %arg1: memref<1x9x9x128xf32, #tpu.memory_space<vmem>>, %arg2: memref<1x9x9x128xf32, #tpu.memory_space<vmem>>, %arg3: memref<1x9x9x128xf32, #tpu.memory_space<vmem>>, %arg4: memref<1x9x9x128xf32, #tpu.memory_space<vmem>>, %arg5: memref<1x8x8x128xf32, #tpu.memory_space<vmem>>) attributes {dimension_semantics = [#tpu.dimension_semantics<parallel>], iteration_bounds = array<i64: 2>, scalar_prefetch = 0 : i64, scratch_operands = 0 : i64, tpu.core_type = #tpu.core_type<tc>, window_params = [{transform_indices = @transform_0, window_bounds = array<i64: 1, 9, 9, 128>}, {transform_indices = @transform_1, window_bounds = array<i64: 1, 9, 9, 128>}, {transform_indices = @transform_2, window_bounds = array<i64: 1, 9, 9, 128>}, {transform_indices = @transform_3, window_bounds = array<i64: 1, 9, 9, 128>}, {transform_indices = @transform_4, window_bounds = array<i64: 1, 8, 8, 128>}]} {
    %c0 = arith.constant 0 : index
    %c0_0 = arith.constant 0 : index
    %c0_1 = arith.constant 0 : index
    %c0_2 = arith.constant 0 : index
    %0 = vector.load %arg1[%c0, %c0_0, %c0_1, %c0_2] : memref<1x9x9x128xf32, #tpu.memory_space<vmem>>, vector<1x9x9x128xf32>
    %c0_3 = arith.constant 0 : index
    %c0_4 = arith.constant 0 : index
    %c0_5 = arith.constant 0 : index
    %c0_6 = arith.constant 0 : index
    %1 = vector.load %arg2[%c0_3, %c0_4, %c0_5, %c0_6] : memref<1x9x9x128xf32, #tpu.memory_space<vmem>>, vector<1x9x9x128xf32>
    %c0_7 = arith.constant 0 : index
    %c0_8 = arith.constant 0 : index
    %c0_9 = arith.constant 0 : index
    %c0_10 = arith.constant 0 : index
    %2 = vector.load %arg3[%c0_7, %c0_8, %c0_9, %c0_10] : memref<1x9x9x128xf32, #tpu.memory_space<vmem>>, vector<1x9x9x128xf32>
    %c0_11 = arith.constant 0 : index
    %c0_12 = arith.constant 0 : index
    %c0_13 = arith.constant 0 : index
    %c0_14 = arith.constant 0 : index
    %3 = vector.load %arg4[%c0_11, %c0_12, %c0_13, %c0_14] : memref<1x9x9x128xf32, #tpu.memory_space<vmem>>, vector<1x9x9x128xf32>
    %4 = vector.extract_strided_slice %0 {offsets = [0, 0, 0, 0], sizes = [1, 8, 8, 128], strides = [1, 1, 1, 1]} : vector<1x9x9x128xf32> to vector<1x8x8x128xf32>
    %5 = vector.extract_strided_slice %1 {offsets = [0, 0, 0, 0], sizes = [1, 8, 8, 128], strides = [1, 1, 1, 1]} : vector<1x9x9x128xf32> to vector<1x8x8x128xf32>
    %6 = arith.maximumf %4, %5 : vector<1x8x8x128xf32>
    %7 = vector.extract_strided_slice %0 {offsets = [0, 0, 1, 0], sizes = [1, 8, 8, 128], strides = [1, 1, 1, 1]} : vector<1x9x9x128xf32> to vector<1x8x8x128xf32>
    %8 = arith.maximumf %6, %7 : vector<1x8x8x128xf32>
    %9 = vector.extract_strided_slice %2 {offsets = [0, 0, 0, 0], sizes = [1, 8, 8, 128], strides = [1, 1, 1, 1]} : vector<1x9x9x128xf32> to vector<1x8x8x128xf32>
    %10 = arith.maximumf %8, %9 : vector<1x8x8x128xf32>
    %11 = vector.extract_strided_slice %3 {offsets = [0, 0, 0, 0], sizes = [1, 8, 8, 128], strides = [1, 1, 1, 1]} : vector<1x9x9x128xf32> to vector<1x8x8x128xf32>
    %12 = arith.maximumf %10, %11 : vector<1x8x8x128xf32>
    %13 = vector.extract_strided_slice %2 {offsets = [0, 0, 1, 0], sizes = [1, 8, 8, 128], strides = [1, 1, 1, 1]} : vector<1x9x9x128xf32> to vector<1x8x8x128xf32>
    %14 = arith.maximumf %12, %13 : vector<1x8x8x128xf32>
    %15 = vector.extract_strided_slice %0 {offsets = [0, 1, 0, 0], sizes = [1, 8, 8, 128], strides = [1, 1, 1, 1]} : vector<1x9x9x128xf32> to vector<1x8x8x128xf32>
    %16 = arith.maximumf %14, %15 : vector<1x8x8x128xf32>
    %17 = vector.extract_strided_slice %1 {offsets = [0, 1, 0, 0], sizes = [1, 8, 8, 128], strides = [1, 1, 1, 1]} : vector<1x9x9x128xf32> to vector<1x8x8x128xf32>
    %18 = arith.maximumf %16, %17 : vector<1x8x8x128xf32>
    %19 = vector.extract_strided_slice %0 {offsets = [0, 1, 1, 0], sizes = [1, 8, 8, 128], strides = [1, 1, 1, 1]} : vector<1x9x9x128xf32> to vector<1x8x8x128xf32>
    %20 = arith.maximumf %18, %19 : vector<1x8x8x128xf32>
    %c0_15 = arith.constant 0 : index
    %c0_16 = arith.constant 0 : index
    %c0_17 = arith.constant 0 : index
    %c0_18 = arith.constant 0 : index
    %21 = vector.load %arg5[%c0_15, %c0_16, %c0_17, %c0_18] : memref<1x8x8x128xf32, #tpu.memory_space<vmem>>, vector<1x8x8x128xf32>
    tpu.vector_store %arg5[%c0_15, %c0_16, %c0_17, %c0_18], %20 {strides = array<i32>} : memref<1x8x8x128xf32, #tpu.memory_space<vmem>>, vector<1x8x8x128xf32>,
    return
  }
  func.func @transform_0(%arg0: i32) -> (i32, i32, i32, i32) {
    %c0_i32 = arith.constant 0 : i32
    %c0_i32_0 = arith.constant 0 : i32
    %c0_i32_1 = arith.constant 0 : i32
    %c0_i32_2 = arith.constant 0 : i32
    return %arg0, %c0_i32, %c0_i32_0, %c0_i32_1 : i32, i32, i32, i32
  }
  func.func @transform_1(%arg0: i32) -> (i32, i32, i32, i32) {
    %c0_i32 = arith.constant 0 : i32
    %c0_i32_0 = arith.constant 0 : i32
    %c0_i32_1 = arith.constant 0 : i32
    %c0_i32_2 = arith.constant 0 : i32
    return %arg0, %c0_i32, %c0_i32_0, %c0_i32_1 : i32, i32, i32, i32
  }
  func.func @transform_2(%arg0: i32) -> (i32, i32, i32, i32) {
    %c0_i32 = arith.constant 0 : i32
    %c0_i32_0 = arith.constant 0 : i32
    %c0_i32_1 = arith.constant 0 : i32
    %c0_i32_2 = arith.constant 0 : i32
    return %arg0, %c0_i32, %c0_i32_0, %c0_i32_1 : i32, i32, i32, i32
  }
  func.func @transform_3(%arg0: i32) -> (i32, i32, i32, i32) {
    %c0_i32 = arith.constant 0 : i32
    %c0_i32_0 = arith.constant 0 : i32
    %c0_i32_1 = arith.constant 0 : i32
    %c0_i32_2 = arith.constant 0 : i32
    return %arg0, %c0_i32, %c0_i32_0, %c0_i32_1 : i32, i32, i32, i32
  }
  func.func @transform_4(%arg0: i32) -> (i32, i32, i32, i32) {
    %c0_i32 = arith.constant 0 : i32
    %c0_i32_0 = arith.constant 0 : i32
    %c0_i32_1 = arith.constant 0 : i32
    %c0_i32_2 = arith.constant 0 : i32
    return %arg0, %c0_i32, %c0_i32_0, %c0_i32_1 : i32, i32, i32, i32
  }
}

module attributes {stable_mosaic.version = 11 : i64} {
  func.func @avgpool_embed_kernel(%arg0: i32, %arg1: memref<2x64x128xf32, #tpu.memory_space<vmem>>, %arg2: memref<128x128xf32, #tpu.memory_space<vmem>>, %arg3: memref<1x128xf32, #tpu.memory_space<vmem>>, %arg4: memref<2x128xf32, #tpu.memory_space<vmem>>, %arg5: memref<2x128xf32, #tpu.memory_space<vmem>>) attributes {dimension_semantics = [#tpu.dimension_semantics<arbitrary>], iteration_bounds = array<i64: 1>, scalar_prefetch = 0 : i64, scratch_operands = 1 : i64, tpu.core_type = #tpu.core_type<tc>, window_params = [{transform_indices = @transform_0, window_bounds = array<i64: 2, 64, 128>}, {pipeline_mode = #tpu.pipeline_mode<synchronous>, transform_indices = @transform_1, window_bounds = array<i64: 128, 128>}, {pipeline_mode = #tpu.pipeline_mode<synchronous>, transform_indices = @transform_2, window_bounds = array<i64: 1, 128>}, {pipeline_mode = #tpu.pipeline_mode<synchronous>, transform_indices = @transform_3, window_bounds = array<i64: 2, 128>}]} {
    %c0_i32 = arith.constant 0 : i32
    %0 = arith.cmpi eq, %arg0, %c0_i32 : i32
    %1 = arith.extui %0 : i1 to i32
    %c0_i32_0 = arith.constant 0 : i32
    %2 = arith.cmpi ne, %1, %c0_i32_0 : i32
    scf.if %2 {
      %cst_9 = arith.constant 0.000000e+00 : f32
      %11 = vector.broadcast %cst_9 : f32 to vector<2x128xf32>
      %c0_10 = arith.constant 0 : index
      %c0_11 = arith.constant 0 : index
      %12 = vector.load %arg5[%c0_10, %c0_11] : memref<2x128xf32, #tpu.memory_space<vmem>>, vector<2x128xf32>
      tpu.vector_store %arg5[%c0_10, %c0_11], %11 {strides = array<i32>} : memref<2x128xf32, #tpu.memory_space<vmem>>, vector<2x128xf32>,
    } else {
    }
    %c0 = arith.constant 0 : index
    %c0_1 = arith.constant 0 : index
    %3 = vector.load %arg5[%c0, %c0_1] : memref<2x128xf32, #tpu.memory_space<vmem>>, vector<2x128xf32>
    %c0_2 = arith.constant 0 : index
    %c0_3 = arith.constant 0 : index
    %c0_4 = arith.constant 0 : index
    %4 = vector.load %arg1[%c0_2, %c0_3, %c0_4] : memref<2x64x128xf32, #tpu.memory_space<vmem>>, vector<2x64x128xf32>
    %cst = arith.constant dense<0.000000e+00> : vector<2x128xf32>
    %5 = vector.multi_reduction <add>, %4, %cst [1] : vector<2x64x128xf32> to vector<2x128xf32>
    %6 = arith.addf %3, %5 : vector<2x128xf32>
    %c0_5 = arith.constant 0 : index
    %c0_6 = arith.constant 0 : index
    %7 = vector.load %arg5[%c0_5, %c0_6] : memref<2x128xf32, #tpu.memory_space<vmem>>, vector<2x128xf32>
    tpu.vector_store %arg5[%c0_5, %c0_6], %6 {strides = array<i32>} : memref<2x128xf32, #tpu.memory_space<vmem>>, vector<2x128xf32>,
    %c0_i32_7 = arith.constant 0 : i32
    %8 = arith.cmpi eq, %arg0, %c0_i32_7 : i32
    %9 = arith.extui %8 : i1 to i32
    %c0_i32_8 = arith.constant 0 : i32
    %10 = arith.cmpi ne, %9, %c0_i32_8 : i32
    scf.if %10 {
      %c0_9 = arith.constant 0 : index
      %c0_10 = arith.constant 0 : index
      %11 = vector.load %arg5[%c0_9, %c0_10] : memref<2x128xf32, #tpu.memory_space<vmem>>, vector<2x128xf32>
      %c0_11 = arith.constant 0 : index
      %c0_12 = arith.constant 0 : index
      %12 = vector.load %arg2[%c0_11, %c0_12] : memref<128x128xf32, #tpu.memory_space<vmem>>, vector<128x128xf32>
      %cst_13 = arith.constant dense<0.000000e+00> : vector<2x128xf32>
      %13 = tpu.matmul %11, %12, %cst_13 {dimension_numbers = #tpu.dot_dimension_numbers<[1], [0], [0], [1], [0, 0, 1, 1], [], []>} : vector<2x128xf32>, vector<128x128xf32>, vector<2x128xf32> -> vector<2x128xf32>
      %c0_14 = arith.constant 0 : index
      %c0_15 = arith.constant 0 : index
      %14 = vector.load %arg3[%c0_14, %c0_15] : memref<1x128xf32, #tpu.memory_space<vmem>>, vector<1x128xf32>
      %15 = vector.broadcast %14 : vector<1x128xf32> to vector<2x128xf32>
      %16 = arith.addf %13, %15 : vector<2x128xf32>
      %c0_16 = arith.constant 0 : index
      %c0_17 = arith.constant 0 : index
      %17 = vector.load %arg4[%c0_16, %c0_17] : memref<2x128xf32, #tpu.memory_space<vmem>>, vector<2x128xf32>
      tpu.vector_store %arg4[%c0_16, %c0_17], %16 {strides = array<i32>} : memref<2x128xf32, #tpu.memory_space<vmem>>, vector<2x128xf32>,
    } else {
    }
    return
  }
  func.func @transform_0(%arg0: i32) -> (i32, i32, i32) {
    %c0_i32 = arith.constant 0 : i32
    %c0_i32_0 = arith.constant 0 : i32
    %c0_i32_1 = arith.constant 0 : i32
    return %c0_i32, %arg0, %c0_i32_0 : i32, i32, i32
  }
  func.func @transform_1(%arg0: i32) -> (i32, i32) {
    %c0_i32 = arith.constant 0 : i32
    %c0_i32_0 = arith.constant 0 : i32
    %c0_i32_1 = arith.constant 0 : i32
    return %c0_i32, %c0_i32_0 : i32, i32
  }
  func.func @transform_2(%arg0: i32) -> (i32, i32) {
    %c0_i32 = arith.constant 0 : i32
    %c0_i32_0 = arith.constant 0 : i32
    %c0_i32_1 = arith.constant 0 : i32
    return %c0_i32, %c0_i32_0 : i32, i32
  }
  func.func @transform_3(%arg0: i32) -> (i32, i32) {
    %c0_i32 = arith.constant 0 : i32
    %c0_i32_0 = arith.constant 0 : i32
    %c0_i32_1 = arith.constant 0 : i32
    return %c0_i32, %c0_i32_0 : i32, i32
  }
}

</mosaic_0001>

<bundles_post_ra>
// kernel: encoder_cnn_forward.4
= control target key start
LH: loop header
LB: loop body
LE: loop exit
PB: predicated region body
PF: predicated region fallthrough
CT: control target
= control target key end

     0   :  { %s631_s15 = smov 0   ;;  %s790_s0 = inlined_call_operand.vmem [shape: f32[2,9,9,128], index: 0, kind: input, shape index: {}]   ;;  %s791_s1 = inlined_call_operand.vmem [shape: f32[2,9,9,128], index: 1, kind: input, shape index: {}]   ;;  %s792_s2 = inlined_call_operand.vmem [shape: f32[2,9,9,128], index: 2, kind: input, shape index: {}]   ;;  %s793_s3 = inlined_call_operand.vmem [shape: f32[2,9,9,128], index: 3, kind: input, shape index: {}]   ;;  %s794_s4 = inlined_call_operand.vmem [shape: f32[2,8,8,128], index: 4, kind: output, shape index: {}]  }
   0x1 LB: > { %s575_s16 = sadd.s32 4294967295, %s604_s15   ;;  %p579_p0 = scmp.ge.s32.totalorder %s604_s15, 1  ;;  %s604_s15 = sphi %s631_s15, %s14_s15  }
   0x2   : > { %p192_p1 = scmp.lt.s32.totalorder %s604_s15, 3 }
   0x4   : > { %p193_p2 = pnand %p579_p0, %p192_p1 }
   0x5   : > { %p233_p3 = scmp.lt.s32.totalorder (!%p193_p2), %s575_s16, 1 }
   0x6   : > { %196 = sbr.rel (%p193_p2) target bundleno = 56 (0x38), region = 36 }
   0xb   : > { %s796_s16 = smov (!%p233_p3, %s575_s16), 1  ;;  %vm333_vm0 = vcmask 1046528  }
   0xc   : > { %s589_s17 = smul.u32 144, %s796_s16  ;;  %s588_s30 = sshll.u32 %s796_s16, 6 }
   0xd   : > { %s739_s7 = scalar_lea.vmem %s794_s4, %s588_s30 }
   0xe   : > { %s645_s20 = scalar_lea.vmem %s790_s0, %s589_s17  ;;  %s650_s23 = scalar_lea.vmem %s791_s1, %s589_s17 }
   0xf   : > { %s655_s26 = scalar_lea.vmem %s792_s2, %s589_s17  ;;  %s660_s29 = scalar_lea.vmem %s793_s3, %s589_s17  ;;  %v258_v0 = vld [vmem:[%s645_s20] sm:$0xff]  ;;  %v259_v1 = vld [vmem:[%s645_s20 + $0x8] sm:$0x1]  ;;  %v665_v2 = vld [vmem:[%s645_s20 + $0x10] sm:$0xff] }
  0x10   : > { %v261_v3 = vld [vmem:[%s645_s20 + $0x18] sm:$0x1]  ;;  %v276_v4 = vld [vmem:[%s650_s23] sm:$0xff]  ;;  %v670_v5 = vld [vmem:[%s650_s23 + $0x10] sm:$0xff]  ;;  %v334_v6 = vrot.slane %v258_v0, 1  ;;  %v335_v7 = vrot.slane %v259_v1, 1 }
  0x11   : > { %v285_v8 = vld [vmem:[%s655_s26] sm:$0xff]  ;;  %v286_v9 = vld [vmem:[%s655_s26 + $0x8] sm:$0x1]  ;;  %v287_v10 = vld [vmem:[%s655_s26 + $0x10] sm:$0xff]  ;;  %v309_v11 = vmax.f32 %v258_v0, %v276_v4  ;;  %v310_v12 = vmax.f32 %v665_v2, %v670_v5  ;;  %v337_v13 = vrot.slane %v665_v2, 1  ;;  %v338_v14 = vrot.slane %v261_v3, 1 }
  0x12   : > { %v301_v15 = vld [vmem:[%s660_s29] sm:$0xff]  ;;  %v336_v16 = vsel %vm333_vm0, %v334_v6, %v335_v7  ;;  %v406_v17 = vrot.slane %v285_v8, 1  ;;  %v407_v18 = vrot.slane %v286_v9, 1  ;;  %v409_v19 = vrot.slane %v287_v10, 1  ;;  %v263_v23 = vld [vmem:[%s645_s20 + $0x28] sm:$0x1] }
  0x13   : > { %v262_v20 = vld [vmem:[%s645_s20 + $0x20] sm:$0xff]  ;;  %v682_v21 = vsel %vm333_vm0, %v337_v13, %v338_v14  ;;  %v366_v22 = vmax.f32 %v309_v11, %v336_v16  ;;  %v288_v25 = vld [vmem:[%s655_s26 + $0x18] sm:$0x1]  ;;  %v302_v27 = vld [vmem:[%s660_s29 + $0x10] sm:$0xff]  ;;  %v341_v31 = vrot.slane %v263_v23, 1 }
  0x14   : > { %v686_v24 = vld [vmem:[%s650_s23 + $0x20] sm:$0xff]  ;;  %v340_v26 = vrot.slane %v262_v20, 1  ;;  %v367_v28 = vmax.f32 %v310_v12, %v682_v21  ;;  %v264_v32 = vld [vmem:[%s645_s20 + $0x30] sm:$0xff]  ;;  %v408_v34 = vsel %vm333_vm0, %v406_v17, %v407_v18  ;;  %v410_v35 = vrot.slane %v288_v25, 1  ;;  %v265_v37 = vld [vmem:[%s645_s20 + $0x38] sm:$0x1] }
  0x15   : > { %v289_v29 = vld [vmem:[%s655_s26 + $0x20] sm:$0xff]  ;;  %v311_v30 = vmax.f32 %v262_v20, %v686_v24  ;;  %v374_v33 = vmax.f32 %v366_v22, %v285_v8  ;;  %v697_v38 = vld [vmem:[%s650_s23 + $0x30] sm:$0xff]  ;;  %v290_v42 = vld [vmem:[%s655_s26 + $0x28] sm:$0x1]  ;;  %v343_v44 = vrot.slane %v264_v32, 1  ;;  %v344_v49 = vrot.slane %v265_v37, 1 }
  0x16   : > { %v412_v36 = vrot.slane %v289_v29, 1  ;;  %v291_v39 = vld [vmem:[%s655_s26 + $0x30] sm:$0xff]  ;;  %v375_v40 = vmax.f32 %v367_v28, %v287_v10  ;;  %v342_v41 = vsel %vm333_vm0, %v340_v26, %v341_v31  ;;  %v312_v43 = vmax.f32 %v264_v32, %v697_v38  ;;  %v704_v45 = vld [vmem:[%s645_s20 + $0x40] sm:$0xff]  ;;  %v267_v50 = vld [vmem:[%s645_s20 + $0x48] sm:$0x1] }
  0x17   : > { %v382_v46 = vmax.f32 %v374_v33, %v301_v15  ;;  %v368_v47 = vmax.f32 %v311_v30, %v342_v41  ;;  %v411_v48 = vsel %vm333_vm0, %v409_v19, %v410_v35  ;;  %v709_v51 = vld [vmem:[%s650_s23 + $0x40] sm:$0xff]  ;;  %v413_v54 = vrot.slane %v290_v42, 1  ;;  %v292_v56 = vld [vmem:[%s655_s26 + $0x38] sm:$0x1]  ;;  %v719_v63 = vld [vmem:[%s645_s20 + $0x50] sm:$0xff] }
  0x18   : > { %v383_v52 = vmax.f32 %v375_v40, %v302_v27  ;;  %v303_v53 = vld [vmem:[%s660_s29 + $0x20] sm:$0xff]  ;;  %v415_v55 = vrot.slane %v291_v39, 1  ;;  %v313_v58 = vmax.f32 %v704_v45, %v709_v51  ;;  %v345_v61 = vsel %vm333_vm0, %v343_v44, %v344_v49  ;;  %v722_v0 = vld [vmem:[%s650_s23 + $0x50] sm:$0xff]  ;;  %v269_v12 = vld [vmem:[%s645_s20 + $0x58] sm:$0x1] }
  0x19   : > { %v293_v57 = vld [vmem:[%s655_s26 + $0x40] sm:$0xff]  ;;  %v438_v59 = vmax.f32 %v382_v46, %v408_v34  ;;  %v376_v60 = vmax.f32 %v368_v47, %v289_v29  ;;  %v346_v62 = vrot.slane %v704_v45, 1  ;;  %v369_v3 = vmax.f32 %v312_v43, %v345_v61  ;;  %v304_v9 = vld [vmem:[%s660_s29 + $0x30] sm:$0xff]  ;;  %v294_v16 = vld [vmem:[%s655_s26 + $0x48] sm:$0x1] }
  0x1a   : > { %v439_v1 = vmax.f32 %v383_v52, %v411_v48  ;;  %v414_v4 = vsel %vm333_vm0, %v412_v36, %v413_v54  ;;  %v347_v6 = vrot.slane %v267_v50, 1  ;;  %v416_v10 = vrot.slane %v292_v56, 1  ;;  %v295_v23 = vld [vmem:[%s655_s26 + $0x50] sm:$0xff]  ;;  %v305_v26 = vld [vmem:[%s660_s29 + $0x40] sm:$0xff]  ;;  %v271_v34 = vld [vmem:[%s645_s20 + $0x68] sm:$0x1] }
  0x1b   : > { %v446_v7 = vmax.f32 %v438_v59, %v665_v2  ;;  %v384_v8 = vmax.f32 %v376_v60, %v303_v53  ;;  %v418_v11 = vrot.slane %v293_v57, 1  ;;  %v377_v14 = vmax.f32 %v369_v3, %v291_v39  ;;  %v270_v33 = vld [vmem:[%s645_s20 + $0x60] sm:$0xff]  ;;  %v296_v40 = vld [vmem:[%s655_s26 + $0x58] sm:$0x1]  ;;  %v272_v46 = vld [vmem:[%s645_s20 + $0x70] sm:$0xff] }
  0x1c   : > { %v447_v13 = vmax.f32 %v439_v1, %v262_v20  ;;  %v348_v15 = vsel %vm333_vm0, %v346_v62, %v347_v6  ;;  %v314_v17 = vmax.f32 %v719_v63, %v722_v0  ;;  %v417_v22 = vsel %vm333_vm0, %v415_v55, %v416_v10  ;;  %v748_v35 = vld [vmem:[%s650_s23 + $0x60] sm:$0xff]  ;;  %v283_v47 = vld [vmem:[%s650_s23 + $0x70] sm:$0xff]  ;;  %v273_v56 = vld [vmem:[%s645_s20 + $0x78] sm:$0x1] }
  0x1d   : > { %v454_v18 = vmax.f32 %v446_v7, %v670_v5  ;;  %v440_v19 = vmax.f32 %v384_v8, %v414_v4  ;;  %v370_v2 = vmax.f32 %v313_v58, %v348_v15  ;;  %v385_v25 = vmax.f32 %v377_v14, %v304_v9  ;;  %v297_v44 = vld [vmem:[%s655_s26 + $0x60] sm:$0xff]  ;;  %v306_v48 = vld [vmem:[%s660_s29 + $0x50] sm:$0xff]  ;;  %v300_v6 = vld [vmem:[%s655_s26 + $0x78] sm:$0x1] }
  0x1e   : > { %v455_v20 = vmax.f32 %v447_v13, %v686_v24  ;;  %v349_v5 = vrot.slane %v719_v63, 1  ;;  %v350_v27 = vrot.slane %v269_v12, 1  ;;  %v419_v31 = vrot.slane %v294_v16, 1  ;;  %v299_v4 = vld [vmem:[%s655_s26 + $0x70] sm:$0xff]  ;;  %v307_v8 = vld [vmem:[%s660_s29 + $0x60] sm:$0xff] }
  0x1f   : > { %v468_v28 = vmax.f32 %v454_v18, %v682_v21  ;;  %v448_v29 = vmax.f32 %v440_v19, %v264_v32  ;;  %v378_v30 = vmax.f32 %v370_v2, %v293_v57  ;;  %v441_v36 = vmax.f32 %v385_v25, %v417_v22  ;;  %v298_v57 = vld [vmem:[%s655_s26 + $0x68] sm:$0x1]  ;;  %v308_v22 = vld [vmem:[%s660_s29 + $0x70] sm:$0xff]  ;;  %v274_v25 = vld [vmem:[%s645_s20 + $0x80] sm:$0xff] }
  0x20   : > { %v469_v24 = vmax.f32 %v455_v20, %v342_v41  ;;  %v351_v37 = vsel %vm333_vm0, %v349_v5, %v350_v27  ;;  %v421_v39 = vrot.slane %v295_v23, 1  ;;  %v420_v43 = vsel %vm333_vm0, %v418_v11, %v419_v31 }
  0x21   : > { %476 = vst [vmem:[%s739_s7] sm:$0xff] %v468_v28  ;;  %v456_v21 = vmax.f32 %v448_v29, %v697_v38  ;;  %v386_v32 = vmax.f32 %v378_v30, %v305_v26  ;;  %v371_v42 = vmax.f32 %v314_v17, %v351_v37  ;;  %v449_v41 = vmax.f32 %v441_v36, %v704_v45  ;;  %v275_v26 = vld [vmem:[%s645_s20 + $0x88] sm:$0x1] }
  0x22   : > { %477 = vst [vmem:[%s739_s7 + $0x8] sm:$0xff] %v469_v24  ;;  %v315_v49 = vmax.f32 %v270_v33, %v748_v35  ;;  %v352_v50 = vrot.slane %v270_v33, 1  ;;  %v353_v52 = vrot.slane %v271_v34, 1  ;;  %v422_v55 = vrot.slane %v296_v40, 1  ;;  %v284_v24 = vld [vmem:[%s650_s23 + $0x80] sm:$0xff] }
  0x23   : > { %v470_v38 = vmax.f32 %v456_v21, %v345_v61  ;;  %v379_v53 = vmax.f32 %v371_v42, %v295_v23  ;;  %v442_v54 = vmax.f32 %v386_v32, %v420_v43  ;;  %v457_v58 = vmax.f32 %v449_v41, %v709_v51 }
  0x24   : > { %v354_v59 = vsel %vm333_vm0, %v352_v50, %v353_v52  ;;  %v424_v60 = vrot.slane %v297_v44, 1  ;;  %v316_v45 = vmax.f32 %v272_v46, %v283_v47  ;;  %v423_v61 = vsel %vm333_vm0, %v421_v39, %v422_v55 }
  0x25   : > { %478 = vst [vmem:[%s739_s7 + $0x10] sm:$0xff] %v470_v38  ;;  %v387_v62 = vmax.f32 %v379_v53, %v306_v48  ;;  %v450_v1 = vmax.f32 %v442_v54, %v719_v63  ;;  %v372_v3 = vmax.f32 %v315_v49, %v354_v59  ;;  %v471_v7 = vmax.f32 %v457_v58, %v348_v15 }
  0x26   : > { %v355_v9 = vrot.slane %v272_v46, 1  ;;  %v356_v51 = vrot.slane %v273_v56, 1  ;;  %v425_v10 = vrot.slane %v298_v57, 1  ;;  %v427_v16 = vrot.slane %v299_v4, 1 }
  0x27   : > { %v458_v11 = vmax.f32 %v450_v1, %v722_v0  ;;  %v380_v12 = vmax.f32 %v372_v3, %v297_v44  ;;  %v443_v13 = vmax.f32 %v387_v62, %v423_v61  ;;  %479 = vst [vmem:[%s739_s7 + $0x18] sm:$0xff] %v471_v7  ;;  %v428_v17 = vrot.slane %v300_v6, 1 }
  0x28   : > { %v357_v63 = vsel %vm333_vm0, %v355_v9, %v356_v51  ;;  %v426_v14 = vsel %vm333_vm0, %v424_v60, %v425_v10  ;;  %v464_v30 = vrot.slane %v274_v25, 1  ;;  %v465_v31 = vrot.slane %v275_v26, 1 }
  0x29   : > { %v472_v15 = vmax.f32 %v458_v11, %v351_v37  ;;  %v388_v18 = vmax.f32 %v380_v12, %v307_v8  ;;  %v451_v19 = vmax.f32 %v443_v13, %v270_v33  ;;  %v373_v2 = vmax.f32 %v316_v45, %v357_v63 }
  0x2a   : > { %v429_v5 = vsel %vm333_vm0, %v427_v16, %v428_v17 }
  0x2b   : > { %480 = vst [vmem:[%s739_s7 + $0x20] sm:$0xff] %v472_v15  ;;  %v459_v0 = vmax.f32 %v451_v19, %v748_v35  ;;  %v381_v23 = vmax.f32 %v373_v2, %v299_v4  ;;  %v444_v20 = vmax.f32 %v388_v18, %v426_v14  ;;  %v466_v35 = vsel %vm333_vm0, %v464_v30, %v465_v31 }
  0x2d   : > { %v473_v27 = vmax.f32 %v459_v0, %v354_v59  ;;  %v389_v28 = vmax.f32 %v381_v23, %v308_v22  ;;  %v452_v29 = vmax.f32 %v444_v20, %v272_v46 }
  0x2f   : > { %481 = vst [vmem:[%s739_s7 + $0x28] sm:$0xff] %v473_v27  ;;  %v460_v33 = vmax.f32 %v452_v29, %v283_v47  ;;  %v445_v34 = vmax.f32 %v389_v28, %v429_v5 }
  0x31   : > { %v474_v36 = vmax.f32 %v460_v33, %v357_v63  ;;  %v453_v37 = vmax.f32 %v445_v34, %v274_v25 }
  0x33   : > { %482 = vst [vmem:[%s739_s7 + $0x30] sm:$0xff] %v474_v36  ;;  %v461_v39 = vmax.f32 %v453_v37, %v284_v24 }
  0x35   : > { %v475_v40 = vmax.f32 %v461_v39, %v466_v35 }
  0x37   : > { %483 = vst [vmem:[%s739_s7 + $0x38] sm:$0xff] %v475_v40 }
  0x38 PF: > { %s14_s15 = sadd.s32 1, %s604_s15  }
  0x39   : > { %p11_p4 = scmp.ge.s32.totalorder %s14_s15, 4  }
  0x3b   :  { %13 = sbr.rel (!%p11_p4) target bundleno = 1 (0x1), region = 75 }

// kernel: encoder_cnn_forward.3
= control target key start
LH: loop header
LB: loop body
LE: loop exit
PB: predicated region body
PF: predicated region fallthrough
CT: control target
= control target key end

     0   :  { %v1320_v0 = vmov 0   ;;  %s1948_s1 = inlined_call_operand.vmem [shape: bf16[256,128], index: 1, kind: input, shape index: {}]   ;;  %s1949_s0 = inlined_call_operand.vmem [shape: bf16[512,256], index: 0, kind: input, shape index: {}]   ;;  %s1950_s2 = inlined_call_operand.vmem [shape: f32[1,128], index: 2, kind: input, shape index: {}]   ;;  %s1951_s3 = inlined_call_operand.vmem [shape: f32[1,128], index: 3, kind: input, shape index: {}]   ;;  %s1952_s4 = inlined_call_operand.vmem [shape: f32[512,128], index: 4, kind: output, shape index: {}]  }
   0x1   :  { %530 = vmatprep.subr.bf16.mxu0 %v1320_v0  ;;  %1175 = vmatprep.subr.bf16.mxu1 %v1320_v0  ;;  %v1208_v1 = vld [vmem:[%s1948_s1 + $0x38] sm:$0xff]   ;;  %v1209_v2 = vld [vmem:[%s1948_s1 + $0x30] sm:$0xff]   ;;  %v1210_v3 = vld [vmem:[%s1948_s1 + $0x28] sm:$0xff]  }
   0x2   :  { %531 = vmatpush1.bf16.msra.mxu0 %v1208_v1  ;;  %1191 = vmatpush1.bf16.msra.mxu1 %v1208_v1  ;;  %v1211_v4 = vld [vmem:[%s1948_s1 + $0x20] sm:$0xff]   ;;  %v1212_v5 = vld [vmem:[%s1948_s1 + $0x18] sm:$0xff]   ;;  %v1213_v7 = vld [vmem:[%s1948_s1 + $0x10] sm:$0xff]  }
   0x3   :  { %532 = vmatprep.subr.bf16.mxu0 %v1320_v0  ;;  %1176 = vmatprep.subr.bf16.mxu1 %v1320_v0  ;;  %v1226_v6 = vld [vmem:[%s1949_s0 + $0x4] ss:$8 sps:$4 sm:$0xff]   ;;  %v1216_v11 = vld [vmem:[%s1948_s1 + $0x78] sm:$0xff]   ;;  %v1217_v12 = vld [vmem:[%s1948_s1 + $0x70] sm:$0xff]  }
   0x4   :  { %v1229_v8 = vld [vmem:[%s1949_s0 + $0x104] ss:$8 sps:$4 sm:$0xff]   ;;  %562 = vmatprep.mubr.bf16.mxu0 %v1226_v6  ;;  %v1220_v15 = vld [vmem:[%s1948_s1 + $0x58] sm:$0xff]   ;;  %v1221_v16 = vld [vmem:[%s1948_s1 + $0x50] sm:$0xff]  }
   0x5   :  { %690 = vmatprep.mubr.bf16.mxu1 %v1229_v8  ;;  %v1214_v9 = vld [vmem:[%s1948_s1 + $0x8] sm:$0xff]   ;;  %v1215_v10 = vld [vmem:[%s1948_s1] sm:$0xff]   ;;  %v1230_v21 = vld [vmem:[%s1949_s0 + $0x14] ss:$8 sps:$4 sm:$0xff]  }
   0x6   :  { %533 = vmatpush1.bf16.msra.mxu0 %v1209_v2  ;;  %1192 = vmatpush1.bf16.msra.mxu1 %v1209_v2  ;;  %v1218_v13 = vld [vmem:[%s1948_s1 + $0x68] sm:$0xff]   ;;  %v1219_v14 = vld [vmem:[%s1948_s1 + $0x60] sm:$0xff]   ;;  %v1232_v22 = vld [vmem:[%s1949_s0 + $0x114] ss:$8 sps:$4 sm:$0xff]  }
   0x7   :  { %534 = vmatprep.subr.bf16.mxu0 %v1320_v0  ;;  %1177 = vmatprep.subr.bf16.mxu1 %v1320_v0  ;;  %v1222_v17 = vld [vmem:[%s1948_s1 + $0x48] sm:$0xff]   ;;  %v1223_v18 = vld [vmem:[%s1948_s1 + $0x40] sm:$0xff]   ;;  %v1234_v23 = vld [vmem:[%s1949_s0 + $0x10] ss:$8 sps:$4 sm:$0xff]  }
   0x8   :  { %v1224_v19 = vld [vmem:[%s1949_s0] ss:$8 sps:$4 sm:$0xff]   ;;  %v1235_v24 = vld [vmem:[%s1949_s0 + $0x110] ss:$8 sps:$4 sm:$0xff]   ;;  %v1236_v25 = vld [vmem:[%s1949_s0 + $0x24] ss:$8 sps:$4 sm:$0xff]  }
   0x9   :  { %v1227_v20 = vld [vmem:[%s1949_s0 + $0x100] ss:$8 sps:$4 sm:$0xff]   ;;  %v1238_v26 = vld [vmem:[%s1949_s0 + $0x124] ss:$8 sps:$4 sm:$0xff]   ;;  %v1242_v29 = vld [vmem:[%s1949_s0 + $0x34] ss:$8 sps:$4 sm:$0xff]  }
   0xa   :  { %535 = vmatpush1.bf16.msra.mxu0 %v1210_v3  ;;  %1193 = vmatpush1.bf16.msra.mxu1 %v1210_v3  ;;  %v1240_v27 = vld [vmem:[%s1949_s0 + $0x20] ss:$8 sps:$4 sm:$0xff]   ;;  %v1244_v30 = vld [vmem:[%s1949_s0 + $0x134] ss:$8 sps:$4 sm:$0xff]   ;;  %v1246_v31 = vld [vmem:[%s1949_s0 + $0x30] ss:$8 sps:$4 sm:$0xff]  }
   0xb   :  { %536 = vmatprep.subr.bf16.mxu0 %v1320_v0  ;;  %1178 = vmatprep.subr.bf16.mxu1 %v1320_v0  ;;  %v1241_v28 = vld [vmem:[%s1949_s0 + $0x120] ss:$8 sps:$4 sm:$0xff]   ;;  %v1247_v32 = vld [vmem:[%s1949_s0 + $0x130] ss:$8 sps:$4 sm:$0xff]   ;;  %v1248_v33 = vld [vmem:[%s1949_s0 + $0x44] ss:$8 sps:$4 sm:$0xff]  }
   0xc   :  { %v1250_v34 = vld [vmem:[%s1949_s0 + $0x144] ss:$8 sps:$4 sm:$0xff]   ;;  %v1252_v35 = vld [vmem:[%s1949_s0 + $0x40] ss:$8 sps:$4 sm:$0xff]   ;;  %v1254_v37 = vld [vmem:[%s1949_s0 + $0x54] ss:$8 sps:$4 sm:$0xff]  }
   0xd   :  { %v1253_v36 = vld [vmem:[%s1949_s0 + $0x140] ss:$8 sps:$4 sm:$0xff]   ;;  %v1256_v38 = vld [vmem:[%s1949_s0 + $0x154] ss:$8 sps:$4 sm:$0xff]   ;;  %v1258_v39 = vld [vmem:[%s1949_s0 + $0x50] ss:$8 sps:$4 sm:$0xff]  }
   0xe   :  { %537 = vmatpush1.bf16.msra.mxu0 %v1211_v4  ;;  %1194 = vmatpush1.bf16.msra.mxu1 %v1211_v4  ;;  %v1259_v40 = vld [vmem:[%s1949_s0 + $0x150] ss:$8 sps:$4 sm:$0xff]   ;;  %v1260_v41 = vld [vmem:[%s1949_s0 + $0x64] ss:$8 sps:$4 sm:$0xff]   ;;  %v1264_v43 = vld [vmem:[%s1949_s0 + $0x60] ss:$8 sps:$4 sm:$0xff]  }
   0xf   :  { %538 = vmatprep.subr.bf16.mxu0 %v1320_v0  ;;  %1179 = vmatprep.subr.bf16.mxu1 %v1320_v0  ;;  %v1262_v42 = vld [vmem:[%s1949_s0 + $0x164] ss:$8 sps:$4 sm:$0xff]   ;;  %v1265_v44 = vld [vmem:[%s1949_s0 + $0x160] ss:$8 sps:$4 sm:$0xff]   ;;  %v1266_v45 = vld [vmem:[%s1949_s0 + $0x74] ss:$8 sps:$4 sm:$0xff]  }
  0x10   :  { %v1268_v46 = vld [vmem:[%s1949_s0 + $0x174] ss:$8 sps:$4 sm:$0xff]   ;;  %v1270_v47 = vld [vmem:[%s1949_s0 + $0x70] ss:$8 sps:$4 sm:$0xff]   ;;  %v1272_v49 = vld [vmem:[%s1949_s0 + $0x84] ss:$8 sps:$4 sm:$0xff]  }
  0x11   :  { %v1271_v48 = vld [vmem:[%s1949_s0 + $0x170] ss:$8 sps:$4 sm:$0xff]   ;;  %v1274_v50 = vld [vmem:[%s1949_s0 + $0x184] ss:$8 sps:$4 sm:$0xff]   ;;  %v1276_v51 = vld [vmem:[%s1949_s0 + $0x80] ss:$8 sps:$4 sm:$0xff]  }
  0x12   :  { %539 = vmatpush1.bf16.msra.mxu0 %v1212_v5  ;;  %1195 = vmatpush1.bf16.msra.mxu1 %v1212_v5  ;;  %v1277_v52 = vld [vmem:[%s1949_s0 + $0x180] ss:$8 sps:$4 sm:$0xff]   ;;  %v1278_v53 = vld [vmem:[%s1949_s0 + $0x94] ss:$8 sps:$4 sm:$0xff]   ;;  %v1282_v55 = vld [vmem:[%s1949_s0 + $0x90] ss:$8 sps:$4 sm:$0xff]  }
  0x13   :  { %540 = vmatprep.subr.bf16.mxu0 %v1320_v0  ;;  %1180 = vmatprep.subr.bf16.mxu1 %v1320_v0  ;;  %v1280_v54 = vld [vmem:[%s1949_s0 + $0x194] ss:$8 sps:$4 sm:$0xff]   ;;  %v1283_v56 = vld [vmem:[%s1949_s0 + $0x190] ss:$8 sps:$4 sm:$0xff]   ;;  %v1284_v57 = vld [vmem:[%s1949_s0 + $0xa4] ss:$8 sps:$4 sm:$0xff]  }
  0x14   :  { %v1286_v58 = vld [vmem:[%s1949_s0 + $0x1a4] ss:$8 sps:$4 sm:$0xff]   ;;  %v1288_v59 = vld [vmem:[%s1949_s0 + $0xa0] ss:$8 sps:$4 sm:$0xff]   ;;  %v1290_v61 = vld [vmem:[%s1949_s0 + $0xb4] ss:$8 sps:$4 sm:$0xff]  }
  0x15   :  { %v1289_v60 = vld [vmem:[%s1949_s0 + $0x1a0] ss:$8 sps:$4 sm:$0xff]   ;;  %v1292_v62 = vld [vmem:[%s1949_s0 + $0x1b4] ss:$8 sps:$4 sm:$0xff]   ;;  %v1294_v63 = vld [vmem:[%s1949_s0 + $0xb0] ss:$8 sps:$4 sm:$0xff]  }
  0x16   :  { %541 = vmatpush1.bf16.msra.mxu0 %v1213_v7  ;;  %1196 = vmatpush1.bf16.msra.mxu1 %v1213_v7  ;;  %v1296_v1 = vld [vmem:[%s1949_s0 + $0xc4] ss:$8 sps:$4 sm:$0xff]   ;;  %v1300_v3 = vld [vmem:[%s1949_s0 + $0xc0] ss:$8 sps:$4 sm:$0xff]   ;;  %v1302_v5 = vld [vmem:[%s1949_s0 + $0xd4] ss:$8 sps:$4 sm:$0xff]  }
  0x17   :  { %542 = vmatprep.subr.bf16.mxu0 %v1320_v0  ;;  %1181 = vmatprep.subr.bf16.mxu1 %v1320_v0  ;;  %v1298_v2 = vld [vmem:[%s1949_s0 + $0x1c4] ss:$8 sps:$4 sm:$0xff]   ;;  %v1301_v4 = vld [vmem:[%s1949_s0 + $0x1c0] ss:$8 sps:$4 sm:$0xff]   ;;  %v1304_v6 = vld [vmem:[%s1949_s0 + $0x1d4] ss:$8 sps:$4 sm:$0xff]  }
  0x18   :  { %v1306_v7 = vld [vmem:[%s1949_s0 + $0xd0] ss:$8 sps:$4 sm:$0xff]  }
  0x19   :  { %v1307_v8 = vld [vmem:[%s1949_s0 + $0x1d0] ss:$8 sps:$4 sm:$0xff]  }
  0x1a   :  { %543 = vmatpush1.bf16.msra.mxu0 %v1214_v9  ;;  %1197 = vmatpush1.bf16.msra.mxu1 %v1214_v9  ;;  %v1308_v9 = vld [vmem:[%s1949_s0 + $0xe4] ss:$8 sps:$4 sm:$0xff]  }
  0x1b   :  { %544 = vmatprep.subr.bf16.mxu0 %v1320_v0  ;;  %1182 = vmatprep.subr.bf16.mxu1 %v1320_v0 }
  0x1e   :  { %545 = vmatpush1.bf16.msra.mxu0 %v1215_v10  ;;  %1198 = vmatpush1.bf16.msra.mxu1 %v1215_v10  ;;  %v1310_v10 = vld [vmem:[%s1949_s0 + $0x1e4] ss:$8 sps:$4 sm:$0xff]  }
  0x1f   :  { %546 = vmatprep.subr.bf16.mxu0 %v1320_v0  ;;  %1183 = vmatprep.subr.bf16.mxu1 %v1320_v0 }
  0x22   :  { %547 = vmatpush2.bf16.msra.mxu0 %v1216_v11  ;;  %1199 = vmatpush2.bf16.msra.mxu1 %v1216_v11  ;;  %v1312_v11 = vld [vmem:[%s1949_s0 + $0xe0] ss:$8 sps:$4 sm:$0xff]  }
  0x23   :  { %548 = vmatprep.subr.bf16.mxu0 %v1320_v0  ;;  %1184 = vmatprep.subr.bf16.mxu1 %v1320_v0 }
  0x26   :  { %549 = vmatpush2.bf16.msra.mxu0 %v1217_v12  ;;  %1200 = vmatpush2.bf16.msra.mxu1 %v1217_v12  ;;  %v1313_v12 = vld [vmem:[%s1949_s0 + $0x1e0] ss:$8 sps:$4 sm:$0xff]  }
  0x27   :  { %550 = vmatprep.subr.bf16.mxu0 %v1320_v0  ;;  %1185 = vmatprep.subr.bf16.mxu1 %v1320_v0 }
  0x2a   :  { %551 = vmatpush2.bf16.msra.mxu0 %v1218_v13  ;;  %1201 = vmatpush2.bf16.msra.mxu1 %v1218_v13  ;;  %v1314_v13 = vld [vmem:[%s1949_s0 + $0xf4] ss:$8 sps:$4 sm:$0xff]  }
  0x2b   :  { %552 = vmatprep.subr.bf16.mxu0 %v1320_v0  ;;  %1186 = vmatprep.subr.bf16.mxu1 %v1320_v0 }
  0x2e   :  { %553 = vmatpush2.bf16.msra.mxu0 %v1219_v14  ;;  %1202 = vmatpush2.bf16.msra.mxu1 %v1219_v14  ;;  %v1316_v14 = vld [vmem:[%s1949_s0 + $0x1f4] ss:$8 sps:$4 sm:$0xff]  }
  0x2f   :  { %554 = vmatprep.subr.bf16.mxu0 %v1320_v0  ;;  %1187 = vmatprep.subr.bf16.mxu1 %v1320_v0 }
  0x32   :  { %555 = vmatpush2.bf16.msra.mxu0 %v1220_v15  ;;  %1203 = vmatpush2.bf16.msra.mxu1 %v1220_v15  ;;  %v1318_v15 = vld [vmem:[%s1949_s0 + $0xf0] ss:$8 sps:$4 sm:$0xff]  }
  0x33   :  { %556 = vmatprep.subr.bf16.mxu0 %v1320_v0  ;;  %1188 = vmatprep.subr.bf16.mxu1 %v1320_v0 }
  0x36   :  { %557 = vmatpush2.bf16.msra.mxu0 %v1221_v16  ;;  %1204 = vmatpush2.bf16.msra.mxu1 %v1221_v16  ;;  %v1319_v16 = vld [vmem:[%s1949_s0 + $0x1f0] ss:$8 sps:$4 sm:$0xff]  }
  0x37   :  { %558 = vmatprep.subr.bf16.mxu0 %v1320_v0  ;;  %1189 = vmatprep.subr.bf16.mxu1 %v1320_v0 }
  0x3a   :  { %559 = vmatpush2.bf16.msra.mxu0 %v1222_v17  ;;  %1205 = vmatpush2.bf16.msra.mxu1 %v1222_v17  ;;  %v1621_v17 = vld [vmem:[%s1950_s2] ss:$0 sm:$0xff] }
  0x3b   :  { %560 = vmatprep.subr.bf16.mxu0 %v1320_v0  ;;  %1190 = vmatprep.subr.bf16.mxu1 %v1320_v0  ;;  %v1295_v0 = vld [vmem:[%s1949_s0 + $0x1b0] ss:$8 sps:$4 sm:$0xff]  }
  0x3e   :  { %561 = vmatpush2.bf16.msra.mxu0 %v1223_v18  ;;  %1206 = vmatpush2.bf16.msra.mxu1 %v1223_v18 }
  0x41   :  { %563 = vmatmul.mubr.bf16.vlgmr.msra.gmra.mxu0 %v1224_v19  ;;  %691 = vmatmul.mubr.bf16.vlgmr.msra.gmra.mxu1 %v1227_v20  ;;  %v1626_v19 = vld [vmem:[%s1951_s3] ss:$0 sm:$0xff] }
  0x42   :  { %570 = vmatprep.mubr.bf16.mxu0 %v1230_v21  ;;  %698 = vmatprep.mubr.bf16.mxu1 %v1232_v22 }
  0x49   :  { %571 = vmatmul.mubr.bf16.gmra.mxu0 %v1234_v23  ;;  %699 = vmatmul.mubr.bf16.gmra.mxu1 %v1235_v24 }
  0x4a   :  { %578 = vmatprep.mubr.bf16.mxu0 %v1236_v25  ;;  %706 = vmatprep.mubr.bf16.mxu1 %v1238_v26 }
  0x51   :  { %579 = vmatmul.mubr.bf16.gmra.mxu0 %v1240_v27  ;;  %707 = vmatmul.mubr.bf16.gmra.mxu1 %v1241_v28 }
  0x52   :  { %586 = vmatprep.mubr.bf16.mxu0 %v1242_v29  ;;  %714 = vmatprep.mubr.bf16.mxu1 %v1244_v30 }
  0x59   :  { %587 = vmatmul.mubr.bf16.gmra.mxu0 %v1246_v31  ;;  %715 = vmatmul.mubr.bf16.gmra.mxu1 %v1247_v32 }
  0x5a   :  { %594 = vmatprep.mubr.bf16.mxu0 %v1248_v33  ;;  %722 = vmatprep.mubr.bf16.mxu1 %v1250_v34 }
  0x61   :  { %595 = vmatmul.mubr.bf16.gmra.mxu0 %v1252_v35  ;;  %723 = vmatmul.mubr.bf16.gmra.mxu1 %v1253_v36 }
  0x62   :  { %602 = vmatprep.mubr.bf16.mxu0 %v1254_v37  ;;  %730 = vmatprep.mubr.bf16.mxu1 %v1256_v38 }
  0x69   :  { %603 = vmatmul.mubr.bf16.gmra.mxu0 %v1258_v39  ;;  %731 = vmatmul.mubr.bf16.gmra.mxu1 %v1259_v40 }
  0x6a   :  { %610 = vmatprep.mubr.bf16.mxu0 %v1260_v41  ;;  %738 = vmatprep.mubr.bf16.mxu1 %v1262_v42 }
  0x71   :  { %611 = vmatmul.mubr.bf16.gmra.mxu0 %v1264_v43  ;;  %739 = vmatmul.mubr.bf16.gmra.mxu1 %v1265_v44 }
  0x72   :  { %618 = vmatprep.mubr.bf16.mxu0 %v1266_v45  ;;  %746 = vmatprep.mubr.bf16.mxu1 %v1268_v46 }
  0x79   :  { %619 = vmatmul.mubr.bf16.gmra.mxu0 %v1270_v47  ;;  %747 = vmatmul.mubr.bf16.gmra.mxu1 %v1271_v48 }
  0x7a   :  { %626 = vmatprep.mubr.bf16.mxu0 %v1272_v49  ;;  %754 = vmatprep.mubr.bf16.mxu1 %v1274_v50 }
  0x81   :  { %627 = vmatmul.mubr.bf16.gmra.mxu0 %v1276_v51  ;;  %755 = vmatmul.mubr.bf16.gmra.mxu1 %v1277_v52 }
  0x82   :  { %634 = vmatprep.mubr.bf16.mxu0 %v1278_v53  ;;  %762 = vmatprep.mubr.bf16.mxu1 %v1280_v54 }
  0x89   :  { %635 = vmatmul.mubr.bf16.gmra.mxu0 %v1282_v55  ;;  %763 = vmatmul.mubr.bf16.gmra.mxu1 %v1283_v56 }
  0x8a   :  { %642 = vmatprep.mubr.bf16.mxu0 %v1284_v57  ;;  %770 = vmatprep.mubr.bf16.mxu1 %v1286_v58 }
  0x91   :  { %643 = vmatmul.mubr.bf16.gmra.mxu0 %v1288_v59  ;;  %771 = vmatmul.mubr.bf16.gmra.mxu1 %v1289_v60 }
  0x92   :  { %650 = vmatprep.mubr.bf16.mxu0 %v1290_v61  ;;  %778 = vmatprep.mubr.bf16.mxu1 %v1292_v62 }
  0x99   :  { %651 = vmatmul.mubr.bf16.gmra.mxu0 %v1294_v63  ;;  %779 = vmatmul.mubr.bf16.gmra.mxu1 %v1295_v0 }
  0x9a   :  { %658 = vmatprep.mubr.bf16.mxu0 %v1296_v1  ;;  %786 = vmatprep.mubr.bf16.mxu1 %v1298_v2 }
  0xa1   :  { %659 = vmatmul.mubr.bf16.gmra.mxu0 %v1300_v3  ;;  %787 = vmatmul.mubr.bf16.gmra.mxu1 %v1301_v4 }
  0xa2   :  { %666 = vmatprep.mubr.bf16.mxu0 %v1302_v5  ;;  %794 = vmatprep.mubr.bf16.mxu1 %v1304_v6 }
  0xa9   :  { %667 = vmatmul.mubr.bf16.gmra.mxu0 %v1306_v7  ;;  %795 = vmatmul.mubr.bf16.gmra.mxu1 %v1307_v8 }
  0xaa   :  { %674 = vmatprep.mubr.bf16.mxu0 %v1308_v9  ;;  %802 = vmatprep.mubr.bf16.mxu1 %v1310_v10 }
  0xb1   :  { %675 = vmatmul.mubr.bf16.gmra.mxu0 %v1312_v11  ;;  %803 = vmatmul.mubr.bf16.gmra.mxu1 %v1313_v12 }
  0xb2   :  { %682 = vmatprep.mubr.bf16.mxu0 %v1314_v13  ;;  %810 = vmatprep.mubr.bf16.mxu1 %v1316_v14 }
  0xb9   :  { %683 = vmatmul.mubr.bf16.gmra.mxu0 %v1318_v15  ;;  %811 = vmatmul.mubr.bf16.gmra.mxu1 %v1319_v16 }
 0x101   :  { %v564_v18 = vpop.f32.mrf.mxu0  ;;  %v692_v20 = vpop.f32.mrf.mxu1 }
 0x102   :  { %v826_v21 = vmul.f32 %v1621_v17, %v564_v18  ;;  %v858_v22 = vmul.f32 %v1621_v17, %v692_v20 }
 0x103   :  { %v566_v23 = vpop.f32.mrf.mxu0  ;;  %v694_v24 = vpop.f32.mrf.mxu1 }
 0x104   :  { %v897_v25 = vadd.f32 %v1626_v19, %v826_v21  ;;  %v929_v26 = vadd.f32 %v1626_v19, %v858_v22 }
 0x105   :  { %v567_v27 = vpop.f32.mrf.mxu0  ;;  %v695_v28 = vpop.f32.mrf.mxu1 }
 0x106   :  { %v961_v29 = vmax.f32 %v897_v25, 0.0  ;;  %v993_v30 = vmax.f32 %v929_v26, 0.0  ;;  %v827_v31 = vmul.f32 %v1621_v17, %v567_v27  ;;  %v859_v32 = vmul.f32 %v1621_v17, %v695_v28 }
 0x107   :  { %v569_v33 = vpop.f32.mrf.mxu0  ;;  %v697_v34 = vpop.f32.mrf.mxu1 }
 0x108   :  { %1025 = vst [vmem:[%s1952_s4] sm:$0xff] %v961_v29  ;;  %1057 = vst [vmem:[%s1952_s4 + $0x100] sm:$0xff] %v993_v30  ;;  %v898_v35 = vadd.f32 %v1626_v19, %v827_v31  ;;  %v930_v36 = vadd.f32 %v1626_v19, %v859_v32 }
 0x109   :  { %v572_v37 = vpop.f32.mrf.mxu0  ;;  %v700_v38 = vpop.f32.mrf.mxu1 }
 0x10a   :  { %v962_v39 = vmax.f32 %v898_v35, 0.0  ;;  %v994_v40 = vmax.f32 %v930_v36, 0.0  ;;  %v828_v41 = vmul.f32 %v1621_v17, %v572_v37  ;;  %v860_v42 = vmul.f32 %v1621_v17, %v700_v38 }
 0x10b   :  { %v574_v43 = vpop.f32.mrf.mxu0  ;;  %v702_v44 = vpop.f32.mrf.mxu1 }
 0x10c   :  { %1026 = vst [vmem:[%s1952_s4 + $0x8] sm:$0xff] %v962_v39  ;;  %1058 = vst [vmem:[%s1952_s4 + $0x108] sm:$0xff] %v994_v40  ;;  %v899_v45 = vadd.f32 %v1626_v19, %v828_v41  ;;  %v931_v46 = vadd.f32 %v1626_v19, %v860_v42 }
 0x10d   :  { %v575_v47 = vpop.f32.mrf.mxu0  ;;  %v703_v48 = vpop.f32.mrf.mxu1 }
 0x10e   :  { %v963_v49 = vmax.f32 %v899_v45, 0.0  ;;  %v995_v50 = vmax.f32 %v931_v46, 0.0  ;;  %v829_v51 = vmul.f32 %v1621_v17, %v575_v47  ;;  %v861_v52 = vmul.f32 %v1621_v17, %v703_v48 }
 0x10f   :  { %v577_v53 = vpop.f32.mrf.mxu0  ;;  %v705_v54 = vpop.f32.mrf.mxu1 }
 0x110   :  { %1027 = vst [vmem:[%s1952_s4 + $0x10] sm:$0xff] %v963_v49  ;;  %1059 = vst [vmem:[%s1952_s4 + $0x110] sm:$0xff] %v995_v50  ;;  %v900_v55 = vadd.f32 %v1626_v19, %v829_v51  ;;  %v932_v56 = vadd.f32 %v1626_v19, %v861_v52 }
 0x111   :  { %v580_v57 = vpop.f32.mrf.mxu0  ;;  %v708_v58 = vpop.f32.mrf.mxu1 }
 0x112   :  { %v964_v59 = vmax.f32 %v900_v55, 0.0  ;;  %v996_v60 = vmax.f32 %v932_v56, 0.0  ;;  %v830_v61 = vmul.f32 %v1621_v17, %v580_v57  ;;  %v862_v62 = vmul.f32 %v1621_v17, %v708_v58 }
 0x113   :  { %v582_v63 = vpop.f32.mrf.mxu0  ;;  %v710_v0 = vpop.f32.mrf.mxu1 }
 0x114   :  { %1028 = vst [vmem:[%s1952_s4 + $0x18] sm:$0xff] %v964_v59  ;;  %1060 = vst [vmem:[%s1952_s4 + $0x118] sm:$0xff] %v996_v60  ;;  %v901_v1 = vadd.f32 %v1626_v19, %v830_v61  ;;  %v933_v2 = vadd.f32 %v1626_v19, %v862_v62 }
 0x115   :  { %v583_v3 = vpop.f32.mrf.mxu0  ;;  %v711_v4 = vpop.f32.mrf.mxu1 }
 0x116   :  { %v965_v5 = vmax.f32 %v901_v1, 0.0  ;;  %v997_v6 = vmax.f32 %v933_v2, 0.0  ;;  %v831_v7 = vmul.f32 %v1621_v17, %v583_v3  ;;  %v863_v8 = vmul.f32 %v1621_v17, %v711_v4 }
 0x117   :  { %v585_v9 = vpop.f32.mrf.mxu0  ;;  %v713_v10 = vpop.f32.mrf.mxu1 }
 0x118   :  { %1029 = vst [vmem:[%s1952_s4 + $0x20] sm:$0xff] %v965_v5  ;;  %1061 = vst [vmem:[%s1952_s4 + $0x120] sm:$0xff] %v997_v6  ;;  %v902_v11 = vadd.f32 %v1626_v19, %v831_v7  ;;  %v934_v12 = vadd.f32 %v1626_v19, %v863_v8 }
 0x119   :  { %v588_v13 = vpop.f32.mrf.mxu0  ;;  %v716_v14 = vpop.f32.mrf.mxu1 }
 0x11a   :  { %v966_v15 = vmax.f32 %v902_v11, 0.0  ;;  %v998_v16 = vmax.f32 %v934_v12, 0.0  ;;  %v832_v18 = vmul.f32 %v1621_v17, %v588_v13  ;;  %v864_v20 = vmul.f32 %v1621_v17, %v716_v14 }
 0x11b   :  { %v590_v21 = vpop.f32.mrf.mxu0  ;;  %v718_v22 = vpop.f32.mrf.mxu1 }
 0x11c   :  { %1030 = vst [vmem:[%s1952_s4 + $0x28] sm:$0xff] %v966_v15  ;;  %1062 = vst [vmem:[%s1952_s4 + $0x128] sm:$0xff] %v998_v16  ;;  %v903_v23 = vadd.f32 %v1626_v19, %v832_v18  ;;  %v935_v24 = vadd.f32 %v1626_v19, %v864_v20 }
 0x11d   :  { %v591_v25 = vpop.f32.mrf.mxu0  ;;  %v719_v26 = vpop.f32.mrf.mxu1 }
 0x11e   :  { %v967_v27 = vmax.f32 %v903_v23, 0.0  ;;  %v999_v28 = vmax.f32 %v935_v24, 0.0  ;;  %v833_v29 = vmul.f32 %v1621_v17, %v591_v25  ;;  %v865_v30 = vmul.f32 %v1621_v17, %v719_v26 }
 0x11f   :  { %v593_v31 = vpop.f32.mrf.mxu0  ;;  %v721_v32 = vpop.f32.mrf.mxu1 }
 0x120   :  { %1031 = vst [vmem:[%s1952_s4 + $0x30] sm:$0xff] %v967_v27  ;;  %1063 = vst [vmem:[%s1952_s4 + $0x130] sm:$0xff] %v999_v28  ;;  %v904_v33 = vadd.f32 %v1626_v19, %v833_v29  ;;  %v936_v34 = vadd.f32 %v1626_v19, %v865_v30 }
 0x121   :  { %v596_v35 = vpop.f32.mrf.mxu0  ;;  %v724_v36 = vpop.f32.mrf.mxu1 }
 0x122   :  { %v968_v37 = vmax.f32 %v904_v33, 0.0  ;;  %v1000_v38 = vmax.f32 %v936_v34, 0.0  ;;  %v834_v39 = vmul.f32 %v1621_v17, %v596_v35  ;;  %v866_v40 = vmul.f32 %v1621_v17, %v724_v36 }
 0x123   :  { %v598_v41 = vpop.f32.mrf.mxu0  ;;  %v726_v42 = vpop.f32.mrf.mxu1 }
 0x124   :  { %1032 = vst [vmem:[%s1952_s4 + $0x38] sm:$0xff] %v968_v37  ;;  %1064 = vst [vmem:[%s1952_s4 + $0x138] sm:$0xff] %v1000_v38  ;;  %v905_v43 = vadd.f32 %v1626_v19, %v834_v39  ;;  %v937_v44 = vadd.f32 %v1626_v19, %v866_v40 }
 0x125   :  { %v599_v45 = vpop.f32.mrf.mxu0  ;;  %v727_v46 = vpop.f32.mrf.mxu1 }
 0x126   :  { %v969_v47 = vmax.f32 %v905_v43, 0.0  ;;  %v1001_v48 = vmax.f32 %v937_v44, 0.0  ;;  %v835_v49 = vmul.f32 %v1621_v17, %v599_v45  ;;  %v867_v50 = vmul.f32 %v1621_v17, %v727_v46 }
 0x127   :  { %v601_v51 = vpop.f32.mrf.mxu0  ;;  %v729_v52 = vpop.f32.mrf.mxu1 }
 0x128   :  { %1033 = vst [vmem:[%s1952_s4 + $0x40] sm:$0xff] %v969_v47  ;;  %1065 = vst [vmem:[%s1952_s4 + $0x140] sm:$0xff] %v1001_v48  ;;  %v906_v53 = vadd.f32 %v1626_v19, %v835_v49  ;;  %v938_v54 = vadd.f32 %v1626_v19, %v867_v50 }
 0x129   :  { %v604_v55 = vpop.f32.mrf.mxu0  ;;  %v732_v56 = vpop.f32.mrf.mxu1 }
 0x12a   :  { %v970_v57 = vmax.f32 %v906_v53, 0.0  ;;  %v1002_v58 = vmax.f32 %v938_v54, 0.0  ;;  %v836_v59 = vmul.f32 %v1621_v17, %v604_v55  ;;  %v868_v60 = vmul.f32 %v1621_v17, %v732_v56 }
 0x12b   :  { %v606_v61 = vpop.f32.mrf.mxu0  ;;  %v734_v62 = vpop.f32.mrf.mxu1 }
 0x12c   :  { %1034 = vst [vmem:[%s1952_s4 + $0x48] sm:$0xff] %v970_v57  ;;  %1066 = vst [vmem:[%s1952_s4 + $0x148] sm:$0xff] %v1002_v58  ;;  %v907_v63 = vadd.f32 %v1626_v19, %v836_v59  ;;  %v939_v0 = vadd.f32 %v1626_v19, %v868_v60 }
 0x12d   :  { %v607_v1 = vpop.f32.mrf.mxu0  ;;  %v735_v2 = vpop.f32.mrf.mxu1 }
 0x12e   :  { %v971_v3 = vmax.f32 %v907_v63, 0.0  ;;  %v1003_v4 = vmax.f32 %v939_v0, 0.0  ;;  %v837_v5 = vmul.f32 %v1621_v17, %v607_v1  ;;  %v869_v6 = vmul.f32 %v1621_v17, %v735_v2 }
 0x12f   :  { %v609_v7 = vpop.f32.mrf.mxu0  ;;  %v737_v8 = vpop.f32.mrf.mxu1 }
 0x130   :  { %1035 = vst [vmem:[%s1952_s4 + $0x50] sm:$0xff] %v971_v3  ;;  %1067 = vst [vmem:[%s1952_s4 + $0x150] sm:$0xff] %v1003_v4  ;;  %v908_v9 = vadd.f32 %v1626_v19, %v837_v5  ;;  %v940_v10 = vadd.f32 %v1626_v19, %v869_v6 }
 0x131   :  { %v612_v11 = vpop.f32.mrf.mxu0  ;;  %v740_v12 = vpop.f32.mrf.mxu1 }
 0x132   :  { %v972_v13 = vmax.f32 %v908_v9, 0.0  ;;  %v1004_v14 = vmax.f32 %v940_v10, 0.0  ;;  %v838_v15 = vmul.f32 %v1621_v17, %v612_v11  ;;  %v870_v16 = vmul.f32 %v1621_v17, %v740_v12 }
 0x133   :  { %v614_v18 = vpop.f32.mrf.mxu0  ;;  %v742_v20 = vpop.f32.mrf.mxu1 }
 0x134   :  { %1036 = vst [vmem:[%s1952_s4 + $0x58] sm:$0xff] %v972_v13  ;;  %1068 = vst [vmem:[%s1952_s4 + $0x158] sm:$0xff] %v1004_v14  ;;  %v909_v21 = vadd.f32 %v1626_v19, %v838_v15  ;;  %v941_v22 = vadd.f32 %v1626_v19, %v870_v16 }
 0x135   :  { %v615_v23 = vpop.f32.mrf.mxu0  ;;  %v743_v24 = vpop.f32.mrf.mxu1 }
 0x136   :  { %v973_v25 = vmax.f32 %v909_v21, 0.0  ;;  %v1005_v26 = vmax.f32 %v941_v22, 0.0  ;;  %v839_v27 = vmul.f32 %v1621_v17, %v615_v23  ;;  %v871_v28 = vmul.f32 %v1621_v17, %v743_v24 }
 0x137   :  { %v617_v29 = vpop.f32.mrf.mxu0  ;;  %v745_v30 = vpop.f32.mrf.mxu1 }
 0x138   :  { %1037 = vst [vmem:[%s1952_s4 + $0x60] sm:$0xff] %v973_v25  ;;  %1069 = vst [vmem:[%s1952_s4 + $0x160] sm:$0xff] %v1005_v26  ;;  %v910_v31 = vadd.f32 %v1626_v19, %v839_v27  ;;  %v942_v32 = vadd.f32 %v1626_v19, %v871_v28 }
 0x139   :  { %v620_v33 = vpop.f32.mrf.mxu0  ;;  %v748_v34 = vpop.f32.mrf.mxu1 }
 0x13a   :  { %v974_v35 = vmax.f32 %v910_v31, 0.0  ;;  %v1006_v36 = vmax.f32 %v942_v32, 0.0  ;;  %v840_v37 = vmul.f32 %v1621_v17, %v620_v33  ;;  %v872_v38 = vmul.f32 %v1621_v17, %v748_v34 }
 0x13b   :  { %v622_v39 = vpop.f32.mrf.mxu0  ;;  %v750_v40 = vpop.f32.mrf.mxu1 }
 0x13c   :  { %1038 = vst [vmem:[%s1952_s4 + $0x68] sm:$0xff] %v974_v35  ;;  %1070 = vst [vmem:[%s1952_s4 + $0x168] sm:$0xff] %v1006_v36  ;;  %v911_v41 = vadd.f32 %v1626_v19, %v840_v37  ;;  %v943_v42 = vadd.f32 %v1626_v19, %v872_v38 }
 0x13d   :  { %v623_v43 = vpop.f32.mrf.mxu0  ;;  %v751_v44 = vpop.f32.mrf.mxu1 }
 0x13e   :  { %v975_v45 = vmax.f32 %v911_v41, 0.0  ;;  %v1007_v46 = vmax.f32 %v943_v42, 0.0  ;;  %v841_v47 = vmul.f32 %v1621_v17, %v623_v43  ;;  %v873_v48 = vmul.f32 %v1621_v17, %v751_v44 }
 0x13f   :  { %v625_v49 = vpop.f32.mrf.mxu0  ;;  %v753_v50 = vpop.f32.mrf.mxu1 }
 0x140   :  { %1039 = vst [vmem:[%s1952_s4 + $0x70] sm:$0xff] %v975_v45  ;;  %1071 = vst [vmem:[%s1952_s4 + $0x170] sm:$0xff] %v1007_v46  ;;  %v912_v51 = vadd.f32 %v1626_v19, %v841_v47  ;;  %v944_v52 = vadd.f32 %v1626_v19, %v873_v48 }
 0x141   :  { %v628_v53 = vpop.f32.mrf.mxu0  ;;  %v756_v54 = vpop.f32.mrf.mxu1 }
 0x142   :  { %v976_v55 = vmax.f32 %v912_v51, 0.0  ;;  %v1008_v56 = vmax.f32 %v944_v52, 0.0  ;;  %v842_v57 = vmul.f32 %v1621_v17, %v628_v53  ;;  %v874_v58 = vmul.f32 %v1621_v17, %v756_v54 }
 0x143   :  { %v630_v59 = vpop.f32.mrf.mxu0  ;;  %v758_v60 = vpop.f32.mrf.mxu1 }
 0x144   :  { %1040 = vst [vmem:[%s1952_s4 + $0x78] sm:$0xff] %v976_v55  ;;  %1072 = vst [vmem:[%s1952_s4 + $0x178] sm:$0xff] %v1008_v56  ;;  %v913_v61 = vadd.f32 %v1626_v19, %v842_v57  ;;  %v945_v62 = vadd.f32 %v1626_v19, %v874_v58 }
 0x145   :  { %v631_v63 = vpop.f32.mrf.mxu0  ;;  %v759_v0 = vpop.f32.mrf.mxu1 }
 0x146   :  { %v977_v1 = vmax.f32 %v913_v61, 0.0  ;;  %v1009_v2 = vmax.f32 %v945_v62, 0.0  ;;  %v843_v3 = vmul.f32 %v1621_v17, %v631_v63  ;;  %v875_v4 = vmul.f32 %v1621_v17, %v759_v0 }
 0x147   :  { %v633_v5 = vpop.f32.mrf.mxu0  ;;  %v761_v6 = vpop.f32.mrf.mxu1 }
 0x148   :  { %1041 = vst [vmem:[%s1952_s4 + $0x80] sm:$0xff] %v977_v1  ;;  %1073 = vst [vmem:[%s1952_s4 + $0x180] sm:$0xff] %v1009_v2  ;;  %v914_v7 = vadd.f32 %v1626_v19, %v843_v3  ;;  %v946_v8 = vadd.f32 %v1626_v19, %v875_v4 }
 0x149   :  { %v636_v9 = vpop.f32.mrf.mxu0  ;;  %v764_v10 = vpop.f32.mrf.mxu1 }
 0x14a   :  { %v978_v11 = vmax.f32 %v914_v7, 0.0  ;;  %v1010_v12 = vmax.f32 %v946_v8, 0.0  ;;  %v844_v13 = vmul.f32 %v1621_v17, %v636_v9  ;;  %v876_v14 = vmul.f32 %v1621_v17, %v764_v10 }
 0x14b   :  { %v638_v15 = vpop.f32.mrf.mxu0  ;;  %v766_v16 = vpop.f32.mrf.mxu1 }
 0x14c   :  { %1042 = vst [vmem:[%s1952_s4 + $0x88] sm:$0xff] %v978_v11  ;;  %1074 = vst [vmem:[%s1952_s4 + $0x188] sm:$0xff] %v1010_v12  ;;  %v915_v18 = vadd.f32 %v1626_v19, %v844_v13  ;;  %v947_v20 = vadd.f32 %v1626_v19, %v876_v14 }
 0x14d   :  { %v639_v21 = vpop.f32.mrf.mxu0  ;;  %v767_v22 = vpop.f32.mrf.mxu1 }
 0x14e   :  { %v979_v23 = vmax.f32 %v915_v18, 0.0  ;;  %v1011_v24 = vmax.f32 %v947_v20, 0.0  ;;  %v845_v25 = vmul.f32 %v1621_v17, %v639_v21  ;;  %v877_v26 = vmul.f32 %v1621_v17, %v767_v22 }
 0x14f   :  { %v641_v27 = vpop.f32.mrf.mxu0  ;;  %v769_v28 = vpop.f32.mrf.mxu1 }
 0x150   :  { %1043 = vst [vmem:[%s1952_s4 + $0x90] sm:$0xff] %v979_v23  ;;  %1075 = vst [vmem:[%s1952_s4 + $0x190] sm:$0xff] %v1011_v24  ;;  %v916_v29 = vadd.f32 %v1626_v19, %v845_v25  ;;  %v948_v30 = vadd.f32 %v1626_v19, %v877_v26 }
 0x151   :  { %v644_v31 = vpop.f32.mrf.mxu0  ;;  %v772_v32 = vpop.f32.mrf.mxu1 }
 0x152   :  { %v980_v33 = vmax.f32 %v916_v29, 0.0  ;;  %v1012_v34 = vmax.f32 %v948_v30, 0.0  ;;  %v846_v35 = vmul.f32 %v1621_v17, %v644_v31  ;;  %v878_v36 = vmul.f32 %v1621_v17, %v772_v32 }
 0x153   :  { %v646_v37 = vpop.f32.mrf.mxu0  ;;  %v774_v38 = vpop.f32.mrf.mxu1 }
 0x154   :  { %1044 = vst [vmem:[%s1952_s4 + $0x98] sm:$0xff] %v980_v33  ;;  %1076 = vst [vmem:[%s1952_s4 + $0x198] sm:$0xff] %v1012_v34  ;;  %v917_v39 = vadd.f32 %v1626_v19, %v846_v35  ;;  %v949_v40 = vadd.f32 %v1626_v19, %v878_v36 }
 0x155   :  { %v647_v41 = vpop.f32.mrf.mxu0  ;;  %v775_v42 = vpop.f32.mrf.mxu1 }
 0x156   :  { %v981_v43 = vmax.f32 %v917_v39, 0.0  ;;  %v1013_v44 = vmax.f32 %v949_v40, 0.0  ;;  %v847_v45 = vmul.f32 %v1621_v17, %v647_v41  ;;  %v879_v46 = vmul.f32 %v1621_v17, %v775_v42 }
 0x157   :  { %v649_v47 = vpop.f32.mrf.mxu0  ;;  %v777_v48 = vpop.f32.mrf.mxu1 }
 0x158   :  { %1045 = vst [vmem:[%s1952_s4 + $0xa0] sm:$0xff] %v981_v43  ;;  %1077 = vst [vmem:[%s1952_s4 + $0x1a0] sm:$0xff] %v1013_v44  ;;  %v918_v49 = vadd.f32 %v1626_v19, %v847_v45  ;;  %v950_v50 = vadd.f32 %v1626_v19, %v879_v46 }
 0x159   :  { %v652_v51 = vpop.f32.mrf.mxu0  ;;  %v780_v52 = vpop.f32.mrf.mxu1 }
 0x15a   :  { %v982_v53 = vmax.f32 %v918_v49, 0.0  ;;  %v1014_v54 = vmax.f32 %v950_v50, 0.0  ;;  %v848_v55 = vmul.f32 %v1621_v17, %v652_v51  ;;  %v880_v56 = vmul.f32 %v1621_v17, %v780_v52 }
 0x15b   :  { %v654_v57 = vpop.f32.mrf.mxu0  ;;  %v782_v58 = vpop.f32.mrf.mxu1 }
 0x15c   :  { %1046 = vst [vmem:[%s1952_s4 + $0xa8] sm:$0xff] %v982_v53  ;;  %1078 = vst [vmem:[%s1952_s4 + $0x1a8] sm:$0xff] %v1014_v54  ;;  %v919_v59 = vadd.f32 %v1626_v19, %v848_v55  ;;  %v951_v60 = vadd.f32 %v1626_v19, %v880_v56 }
 0x15d   :  { %v655_v61 = vpop.f32.mrf.mxu0  ;;  %v783_v62 = vpop.f32.mrf.mxu1 }
 0x15e   :  { %v983_v63 = vmax.f32 %v919_v59, 0.0  ;;  %v1015_v0 = vmax.f32 %v951_v60, 0.0  ;;  %v849_v1 = vmul.f32 %v1621_v17, %v655_v61  ;;  %v881_v2 = vmul.f32 %v1621_v17, %v783_v62 }
 0x15f   :  { %v657_v3 = vpop.f32.mrf.mxu0  ;;  %v785_v4 = vpop.f32.mrf.mxu1 }
 0x160   :  { %1047 = vst [vmem:[%s1952_s4 + $0xb0] sm:$0xff] %v983_v63  ;;  %1079 = vst [vmem:[%s1952_s4 + $0x1b0] sm:$0xff] %v1015_v0  ;;  %v920_v5 = vadd.f32 %v1626_v19, %v849_v1  ;;  %v952_v6 = vadd.f32 %v1626_v19, %v881_v2 }
 0x161   :  { %v660_v7 = vpop.f32.mrf.mxu0  ;;  %v788_v8 = vpop.f32.mrf.mxu1 }
 0x162   :  { %v984_v9 = vmax.f32 %v920_v5, 0.0  ;;  %v1016_v10 = vmax.f32 %v952_v6, 0.0  ;;  %v850_v11 = vmul.f32 %v1621_v17, %v660_v7  ;;  %v882_v12 = vmul.f32 %v1621_v17, %v788_v8 }
 0x163   :  { %v662_v13 = vpop.f32.mrf.mxu0  ;;  %v790_v14 = vpop.f32.mrf.mxu1 }
 0x164   :  { %1048 = vst [vmem:[%s1952_s4 + $0xb8] sm:$0xff] %v984_v9  ;;  %1080 = vst [vmem:[%s1952_s4 + $0x1b8] sm:$0xff] %v1016_v10  ;;  %v921_v15 = vadd.f32 %v1626_v19, %v850_v11  ;;  %v953_v16 = vadd.f32 %v1626_v19, %v882_v12 }
 0x165   :  { %v663_v18 = vpop.f32.mrf.mxu0  ;;  %v791_v20 = vpop.f32.mrf.mxu1 }
 0x166   :  { %v985_v21 = vmax.f32 %v921_v15, 0.0  ;;  %v1017_v22 = vmax.f32 %v953_v16, 0.0  ;;  %v851_v23 = vmul.f32 %v1621_v17, %v663_v18  ;;  %v883_v24 = vmul.f32 %v1621_v17, %v791_v20 }
 0x167   :  { %v665_v25 = vpop.f32.mrf.mxu0  ;;  %v793_v26 = vpop.f32.mrf.mxu1 }
 0x168   :  { %1049 = vst [vmem:[%s1952_s4 + $0xc0] sm:$0xff] %v985_v21  ;;  %1081 = vst [vmem:[%s1952_s4 + $0x1c0] sm:$0xff] %v1017_v22  ;;  %v922_v27 = vadd.f32 %v1626_v19, %v851_v23  ;;  %v954_v28 = vadd.f32 %v1626_v19, %v883_v24 }
 0x169   :  { %v668_v29 = vpop.f32.mrf.mxu0  ;;  %v796_v30 = vpop.f32.mrf.mxu1 }
 0x16a   :  { %v986_v31 = vmax.f32 %v922_v27, 0.0  ;;  %v1018_v32 = vmax.f32 %v954_v28, 0.0  ;;  %v852_v33 = vmul.f32 %v1621_v17, %v668_v29  ;;  %v884_v34 = vmul.f32 %v1621_v17, %v796_v30 }
 0x16b   :  { %v670_v35 = vpop.f32.mrf.mxu0  ;;  %v798_v36 = vpop.f32.mrf.mxu1 }
 0x16c   :  { %1050 = vst [vmem:[%s1952_s4 + $0xc8] sm:$0xff] %v986_v31  ;;  %1082 = vst [vmem:[%s1952_s4 + $0x1c8] sm:$0xff] %v1018_v32  ;;  %v923_v37 = vadd.f32 %v1626_v19, %v852_v33  ;;  %v955_v38 = vadd.f32 %v1626_v19, %v884_v34 }
 0x16d   :  { %v671_v39 = vpop.f32.mrf.mxu0  ;;  %v799_v40 = vpop.f32.mrf.mxu1 }
 0x16e   :  { %v987_v41 = vmax.f32 %v923_v37, 0.0  ;;  %v1019_v42 = vmax.f32 %v955_v38, 0.0  ;;  %v853_v43 = vmul.f32 %v1621_v17, %v671_v39  ;;  %v885_v44 = vmul.f32 %v1621_v17, %v799_v40 }
 0x16f   :  { %v673_v45 = vpop.f32.mrf.mxu0  ;;  %v801_v46 = vpop.f32.mrf.mxu1 }
 0x170   :  { %1051 = vst [vmem:[%s1952_s4 + $0xd0] sm:$0xff] %v987_v41  ;;  %1083 = vst [vmem:[%s1952_s4 + $0x1d0] sm:$0xff] %v1019_v42  ;;  %v924_v47 = vadd.f32 %v1626_v19, %v853_v43  ;;  %v956_v48 = vadd.f32 %v1626_v19, %v885_v44 }
 0x171   :  { %v676_v49 = vpop.f32.mrf.mxu0  ;;  %v804_v50 = vpop.f32.mrf.mxu1 }
 0x172   :  { %v988_v51 = vmax.f32 %v924_v47, 0.0  ;;  %v1020_v52 = vmax.f32 %v956_v48, 0.0  ;;  %v854_v53 = vmul.f32 %v1621_v17, %v676_v49  ;;  %v886_v54 = vmul.f32 %v1621_v17, %v804_v50 }
 0x173   :  { %v678_v55 = vpop.f32.mrf.mxu0  ;;  %v806_v56 = vpop.f32.mrf.mxu1 }
 0x174   :  { %1052 = vst [vmem:[%s1952_s4 + $0xd8] sm:$0xff] %v988_v51  ;;  %1084 = vst [vmem:[%s1952_s4 + $0x1d8] sm:$0xff] %v1020_v52  ;;  %v925_v57 = vadd.f32 %v1626_v19, %v854_v53  ;;  %v957_v58 = vadd.f32 %v1626_v19, %v886_v54 }
 0x175   :  { %v679_v59 = vpop.f32.mrf.mxu0  ;;  %v807_v60 = vpop.f32.mrf.mxu1 }
 0x176   :  { %v989_v61 = vmax.f32 %v925_v57, 0.0  ;;  %v1021_v62 = vmax.f32 %v957_v58, 0.0  ;;  %v855_v63 = vmul.f32 %v1621_v17, %v679_v59  ;;  %v887_v0 = vmul.f32 %v1621_v17, %v807_v60 }
 0x177   :  { %v681_v1 = vpop.f32.mrf.mxu0  ;;  %v809_v2 = vpop.f32.mrf.mxu1 }
 0x178   :  { %1053 = vst [vmem:[%s1952_s4 + $0xe0] sm:$0xff] %v989_v61  ;;  %1085 = vst [vmem:[%s1952_s4 + $0x1e0] sm:$0xff] %v1021_v62  ;;  %v926_v3 = vadd.f32 %v1626_v19, %v855_v63  ;;  %v958_v4 = vadd.f32 %v1626_v19, %v887_v0 }
 0x179   :  { %v684_v5 = vpop.f32.mrf.mxu0  ;;  %v812_v6 = vpop.f32.mrf.mxu1 }
 0x17a   :  { %v990_v7 = vmax.f32 %v926_v3, 0.0  ;;  %v1022_v8 = vmax.f32 %v958_v4, 0.0  ;;  %v856_v9 = vmul.f32 %v1621_v17, %v684_v5  ;;  %v888_v10 = vmul.f32 %v1621_v17, %v812_v6 }
 0x17b   :  { %v686_v11 = vpop.f32.mrf.mxu0  ;;  %v814_v12 = vpop.f32.mrf.mxu1 }
 0x17c   :  { %1054 = vst [vmem:[%s1952_s4 + $0xe8] sm:$0xff] %v990_v7  ;;  %1086 = vst [vmem:[%s1952_s4 + $0x1e8] sm:$0xff] %v1022_v8  ;;  %v927_v13 = vadd.f32 %v1626_v19, %v856_v9  ;;  %v959_v14 = vadd.f32 %v1626_v19, %v888_v10 }
 0x17d   :  { %v687_v15 = vpop.f32.mrf.mxu0  ;;  %v815_v16 = vpop.f32.mrf.mxu1 }
 0x17e   :  { %v991_v18 = vmax.f32 %v927_v13, 0.0  ;;  %v1023_v20 = vmax.f32 %v959_v14, 0.0  ;;  %v857_v21 = vmul.f32 %v1621_v17, %v687_v15  ;;  %v889_v22 = vmul.f32 %v1621_v17, %v815_v16 }
 0x17f   :  { %v689_v23 = vpop.f32.mrf.mxu0  ;;  %v817_v24 = vpop.f32.mrf.mxu1 }
 0x180   :  { %1055 = vst [vmem:[%s1952_s4 + $0xf0] sm:$0xff] %v991_v18  ;;  %1087 = vst [vmem:[%s1952_s4 + $0x1f0] sm:$0xff] %v1023_v20  ;;  %v928_v25 = vadd.f32 %v1626_v19, %v857_v21  ;;  %v960_v26 = vadd.f32 %v1626_v19, %v889_v22 }
 0x182   :  { %v992_v27 = vmax.f32 %v928_v25, 0.0  ;;  %v1024_v28 = vmax.f32 %v960_v26, 0.0 }
 0x184   :  { %1056 = vst [vmem:[%s1952_s4 + $0xf8] sm:$0xff] %v992_v27  ;;  %1088 = vst [vmem:[%s1952_s4 + $0x1f8] sm:$0xff] %v1024_v28 }

// kernel: encoder_cnn_forward.5
= control target key start
LH: loop header
LB: loop body
LE: loop exit
PB: predicated region body
PF: predicated region fallthrough
CT: control target
= control target key end

     0   :  { %v260_v1 = vmov 0.0   ;;  %vm261_vm0 = vmmov 0   ;;  %s403_s0 = inlined_call_operand.vmem [shape: f32[2,64,128], index: 0, kind: input, shape index: {}]   ;;  %s404_s1 = inlined_call_operand.vmem [shape: f32[128,128], index: 1, kind: input, shape index: {}]   ;;  %s405_s2 = inlined_call_operand.vmem [shape: f32[1,128], index: 2, kind: input, shape index: {}]   ;;  %s406_s3 = inlined_call_operand.hbm [shape: f32[2,128], index: 3, kind: output, shape index: {}]  }
   0x1   :  { %v89_v0 = vld [vmem:[%s404_s1 + $0x78] sm:$0xff]  ;;  %200 = vmatprep.subr.mxu0 %v260_v1  ;;  %19 = vst [vmem:[#allocation2] sm:$0x3] %v260_v1  ;;  %v88_v2 = vld [vmem:[%s404_s1 + $0x70] sm:$0xff]  ;;  %232 = vmatprep.mubr.msk.f32.mxu0 %vm261_vm0, %v260_v1  ;;  %v87_v3 = vld [vmem:[%s404_s1 + $0x68] sm:$0xff] }
   0x2   :  { %201 = vmatpush3.msra.mxu0 %v89_v0  ;;  %v86_v4 = vld [vmem:[%s404_s1 + $0x60] sm:$0xff]  ;;  %v22_v6 = vld [vmem:[%s403_s0 + $0x8] sm:$0xff]  ;;  %v23_v7 = vld [vmem:[%s403_s0 + $0x10] sm:$0xff] }
   0x3   :  { %202 = vmatprep.subr.mxu0 %v260_v1  ;;  %v21_v5 = vld [vmem:[%s403_s0] sm:$0xff]  ;;  %v85_v9 = vld [vmem:[%s404_s1 + $0x58] sm:$0xff]  ;;  %v30_v12 = vld [vmem:[%s403_s0 + $0x48] sm:$0xff] }
   0x4   :  { %203 = vmatpush3.msra.mxu0 %v88_v2  ;;  %v37_v8 = vadd.f32 %v22_v6, %v21_v5  ;;  %v24_v10 = vld [vmem:[%s403_s0 + $0x18] sm:$0xff]  ;;  %v29_v11 = vld [vmem:[%s403_s0 + $0x40] sm:$0xff]  ;;  %v84_v14 = vld [vmem:[%s404_s1 + $0x50] sm:$0xff] }
   0x5   :  { %204 = vmatprep.subr.mxu0 %v260_v1  ;;  %v25_v15 = vld [vmem:[%s403_s0 + $0x20] sm:$0xff]  ;;  %v31_v16 = vld [vmem:[%s403_s0 + $0x50] sm:$0xff]  ;;  %v50_v17 = vadd.f32 %v30_v12, %v29_v11  ;;  %v32_v18 = vld [vmem:[%s403_s0 + $0x58] sm:$0xff] }
   0x6   :  { %205 = vmatpush3.msra.mxu0 %v87_v3  ;;  %v38_v13 = vadd.f32 %v37_v8, %v23_v7  ;;  %v83_v20 = vld [vmem:[%s404_s1 + $0x48] sm:$0xff] }
   0x7   :  { %206 = vmatprep.subr.mxu0 %v260_v1  ;;  %v26_v21 = vld [vmem:[%s403_s0 + $0x28] sm:$0xff]  ;;  %v51_v22 = vadd.f32 %v50_v17, %v31_v16 }
   0x8   :  { %207 = vmatpush3.msra.mxu0 %v86_v4  ;;  %v39_v19 = vadd.f32 %v38_v13, %v24_v10 }
   0x9   :  { %208 = vmatprep.subr.mxu0 %v260_v1 }
   0xa   :  { %209 = vmatpush3.msra.mxu0 %v85_v9 }
   0xb   :  { %210 = vmatprep.subr.mxu0 %v260_v1 }
   0xc   :  { %8 = vsyncpa [#allocation4], 0  ;;  %211 = vmatpush3.msra.mxu0 %v84_v14  ;;  %v33_v23 = vld [vmem:[%s403_s0 + $0x60] sm:$0xff]  ;;  %v40_v24 = vadd.f32 %v39_v19, %v25_v15  ;;  %v27_v26 = vld [vmem:[%s403_s0 + $0x30] sm:$0xff]  ;;  %v52_v27 = vadd.f32 %v51_v22, %v32_v18  ;;  %vm65_vm1 = vcmask 1041409  }
   0xd   :  { %212 = vmatprep.subr.mxu0 %v260_v1  ;;  %v82_v25 = vld [vmem:[%s404_s1 + $0x40] sm:$0xff]  ;;  %v34_v28 = vld [vmem:[%s403_s0 + $0x68] sm:$0xff]  ;;  %v81_v30 = vld [vmem:[%s404_s1 + $0x38] sm:$0xff] }
   0xe   :  { %213 = vmatpush3.msra.mxu0 %v83_v20  ;;  %v41_v29 = vadd.f32 %v40_v24, %v26_v21  ;;  %v28_v31 = vld [vmem:[%s403_s0 + $0x38] sm:$0xff]  ;;  %v53_v32 = vadd.f32 %v52_v27, %v33_v23  ;;  %v35_v33 = vld [vmem:[%s403_s0 + $0x70] sm:$0xff]  ;;  %v79_v39 = vld [vmem:[%s404_s1 + $0x28] sm:$0xff] }
   0xf   :  { %214 = vmatprep.subr.mxu0 %v260_v1  ;;  %v80_v35 = vld [vmem:[%s404_s1 + $0x30] sm:$0xff]  ;;  %v36_v37 = vld [vmem:[%s403_s0 + $0x78] sm:$0xff]  ;;  %v78_v42 = vld [vmem:[%s404_s1 + $0x20] sm:$0xff] }
  0x10   :  { %215 = vmatpush3.msra.mxu0 %v82_v25  ;;  %v42_v34 = vadd.f32 %v41_v29, %v27_v26  ;;  %v54_v36 = vadd.f32 %v53_v32, %v34_v28  ;;  %v77_v45 = vld [vmem:[%s404_s1 + $0x18] sm:$0xff]  ;;  %v76_v48 = vld [vmem:[%s404_s1 + $0x10] sm:$0xff]  ;;  %v75_v51 = vld [vmem:[%s404_s1 + $0x8] sm:$0xff] }
  0x11   :  { %216 = vmatprep.subr.mxu0 %v260_v1  ;;  %v74_v54 = vld [vmem:[%s404_s1] sm:$0xff]  ;;  %s262_s1 = smov [#allocation3]  }
  0x12   :  { %217 = vmatpush3.msra.mxu0 %v81_v30  ;;  %v43_v38 = vadd.f32 %v42_v34, %v28_v31  ;;  %v55_v40 = vadd.f32 %v54_v36, %v35_v33  ;;  %v20_v58 = vld [vmem:[#allocation2] sm:$0x3]  ;;  %s174_s23 = sshll.u32 %s262_s1, 4  ;;  %s175_s23 = int_to_ptr.vmem [resolvable:$true] %s174_s23 }
  0x13   :  { %218 = vmatprep.subr.mxu0 %v260_v1  ;;  %v182_v63 = vld [vmem:[%s405_s2] ss:$0 sm:$0xff]  ;;  %s238_s24 = scalar_lea.vmem %s175_s23, 32  ;;  %p243_p1 = scmp.lt.s32.totalorder %s175_s23, %s175_s23 }
  0x14   :  { %219 = vmatpush3.msra.mxu0 %v80_v35  ;;  %v44_v41 = vrot.slane %v43_v38, 4  ;;  %v56_v43 = vadd.f32 %v55_v40, %v36_v37  ;;  %p239_p0 = scmp.ne.s32.totalorder %s175_s23, %s238_s24  ;;  %p244_p2 = scmp.lt.s32.totalorder %s238_s24, %s238_s24 }
  0x15   :  { %220 = vmatprep.subr.mxu0 %v260_v1 }
  0x16   :  { %221 = vmatpush3.msra.mxu0 %v79_v39  ;;  %v45_v44 = vadd.f32 %v44_v41, %v43_v38  ;;  %v57_v46 = vrot.slane %v56_v43, 4  ;;  %p245_p3 = por %p244_p2, %p243_p1 }
  0x17   :  { %222 = vmatprep.subr.mxu0 %v260_v1 }
  0x18   :  { %223 = vmatpush3.msra.mxu0 %v78_v42  ;;  %v46_v47 = vrot.slane %v45_v44, 2  ;;  %v58_v49 = vadd.f32 %v57_v46, %v56_v43  ;;  %p246_p4 = pnand %p245_p3, %p239_p0 }
  0x19   :  { %224 = vmatprep.subr.mxu0 %v260_v1 }
  0x1a   :  { %225 = vmatpush3.msra.mxu0 %v77_v45  ;;  %v47_v50 = vadd.f32 %v46_v47, %v45_v44  ;;  %v59_v52 = vrot.slane %v58_v49, 2 }
  0x1b   :  { %226 = vmatprep.subr.mxu0 %v260_v1 }
  0x1c   :  { %227 = vmatpush3.msra.mxu0 %v76_v48  ;;  %v48_v53 = vrot.slane %v47_v50, 1  ;;  %v60_v55 = vadd.f32 %v59_v52, %v58_v49 }
  0x1d   :  { %228 = vmatprep.subr.mxu0 %v260_v1 }
  0x1e   :  { %229 = vmatpush3.msra.mxu0 %v75_v51  ;;  %v49_v56 = vadd.f32 %v48_v53, %v47_v50  ;;  %v61_v57 = vrot.slane %v60_v55, 1 }
  0x1f   :  { %230 = vmatprep.subr.mxu0 %v260_v1 }
  0x20   :  { %231 = vmatpush3.msra.mxu0 %v74_v54  ;;  %v62_v59 = vadd.f32 %v61_v57, %v60_v55 }
  0x22   :  { %v66_v60 = vsel %vm65_vm1, %v62_v59, %v49_v56 }
  0x23   :  { %v68_v61 = vadd.f32 %v66_v60, %v20_v58 }
  0x25   :  { %69 = vst [vmem:[#allocation2] sm:$0x3] %v68_v61 }
  0x2c   :  { %v73_v62 = vld [vmem:[#allocation2] sm:$0x3] }
  0x2d   :  { %233 = vmatmul.mubr.f32.vlgmr.msra.gmra.mxu0 %v73_v62 }
  0xed   :  { %v163_v0 = vpop.f32.mrf.mxu0 }
  0xee   :  { %v164_v2 = vadd.f32 %v182_v63, %v163_v0 }
  0xef   :  { %v234_v1 = vpop.f32.mrf.mxu0 }
  0xf0   :  { %167 = vst [vmem:[#allocation3] sm:$0x3] %v164_v2 }
  0xf1   :  { %249 = shalt.err (!%p246_p4)
}
  0xf2   :  { %177 = dma.vmem_to_hbm [thread:$0]  %s175_s23, 32, %s406_s3, [#allocation4]  }
  0xf3   :  { %258 = dma.done.wait [#allocation4], 32  }
  0xf4   :  { %259 = vsyncadd [#allocation4], 4294967264 }
  0xf5   :  { %181 = vsyncpa [#allocation4], 1 }

</bundles_post_ra>
